<compile_context>
chip_gen: v6e
topology: v6e:2x2x1
jax: 0.10.0
libtpu: 0.0.40
codegen_flags: <defaults>
</compile_context>

<pallas_src>
import functools

import jax
import jax.numpy as jnp
from jax.experimental import pallas as pl
from jax.experimental.pallas import tpu as pltpu


# ---------------------------------------------------------------------------
# Fused forward kernel (single grid step, whole batch stacked along sublanes)
# ---------------------------------------------------------------------------
def _fused_kernel(x_ref, *refs, dims, w2, batch):
    """Per conv layer (bias/BN already folded into packed weights):
         z   = [h<<0 | h<<1 | h<<2] @ Wcat      (one dot, 3 W-taps fused along K)
         th  = max of 3 lane-offset slices       (H window of the 3x3 maxpool)
         thm = max of 3 sublane-offset slices    (W window, stride 1)
         h   = sel @ thm                         (exact 0/1 stride-2 pick, per batch block)
       Tail: out[b] = sum_w h[w*B+b, :] @ Wc[w] + bc   (BN2+lin0+lin1 folded, no flatten).
    """
    *in_refs, o_ref = refs
    h = x_ref[...]                                   # (B*W0, H0*Cin) bf16
    r = 0
    for (c_out, hpc) in dims:
        wcat_ref, sel_ref = in_refs[r], in_refs[r + 1]
        r += 2
        hb = h.astype(jnp.bfloat16)
        rows = hb.shape[0]
        lhs = jnp.concatenate(
            [hb[0:rows - 2, :], hb[1:rows - 1, :], hb[2:rows, :]], axis=1)
        z = jnp.dot(lhs, wcat_ref[...], preferred_element_type=jnp.float32)
        # MaxPool H window (size 3, stride 1): lane-offset slices of the packed dim.
        th = jnp.maximum(jnp.maximum(z[:, 0:hpc], z[:, c_out:c_out + hpc]),
                         z[:, 2 * c_out:2 * c_out + hpc])
        # MaxPool W window (size 3) at stride 1 (sublane-offset slices) ...
        thm = jnp.maximum(jnp.maximum(th[0:rows - 4, :], th[1:rows - 3, :]),
                          th[2:rows - 2, :])
        # ... then the per-batch stride-2 pick as an exact precomputed 0/1 matmul.
        h = jnp.dot(sel_ref[...], thm, preferred_element_type=jnp.float32)
    wc_ref, bc_ref = in_refs[r], in_refs[r + 1]
    hb = h.astype(jnp.bfloat16)                      # (W2*B, H2*C2), rows = (w, b) pairs
    acc = jnp.dot(hb[0:batch, :], wc_ref[0], preferred_element_type=jnp.float32)
    for w in range(1, w2):
        acc = acc + jnp.dot(hb[w * batch:(w + 1) * batch, :], wc_ref[w],
                            preferred_element_type=jnp.float32)
    o_ref[...] = acc + bc_ref[...]


# ---------------------------------------------------------------------------
# Parameter packing (tiny, one-time, fused into the jit) + wrapper
# ---------------------------------------------------------------------------
def _pack_conv_weight(w, h_in, s_prev):
    """(Cout, Cin, 3, 3) conv weight -> (3*Hin*Cin, Ho*Cout) banded matrix: the 3 W-taps
    stacked along K and the previous layer's BN scale folded into the K rows.
      Wcat[q*Hin*Cin + i'*Cin + ci, i*Cout + co] = w[co, ci, i'-i, q] * s_prev[ci]."""
    c_out, c_in, kh, kw = w.shape
    h_out = h_in - kh + 1
    wt = jnp.transpose(w, (2, 3, 1, 0))                              # (kh, kw, Cin, Cout)
    p = jnp.arange(h_in)[:, None] - jnp.arange(h_out)[None, :]       # (Hin, Ho)
    valid = (p >= 0) & (p < kh)
    g = wt[jnp.clip(p, 0, kh - 1)]                                   # (Hin, Ho, kw, Cin, Cout)
    g = g * valid[:, :, None, None, None].astype(w.dtype)
    g = jnp.transpose(g, (2, 0, 3, 1, 4))                            # (kw, Hin, Cin, Ho, Cout)
    g = g * s_prev[None, None, :, None, None]
    return g.reshape(kw * h_in * c_in, h_out * c_out)


def _make_sel(b, w_in, w_p, interleave):
    """0/1 pick matrix for the stride-2 W pool on the batch-stacked layout.
    Row (b, j) selects stacked thm row b*w_in + 2j.  `interleave` orders output rows
    (j-major, batch-minor) so the tail can take contiguous per-position row pairs."""
    rows, cols = b * w_p, b * w_in - 4
    ridx = jnp.arange(rows)
    if interleave:
        bb, jj = ridx % b, ridx // b
    else:
        bb, jj = ridx // w_p, ridx % w_p
    src = bb * w_in + 2 * jj
    return (src[:, None] == jnp.arange(cols)[None, :]).astype(jnp.float32)


def classifier_cnn2d_forward(x, params, num_cnn=3, eps=1e-5):
    B, H, W = x.shape
    # Batch-stacked packing: rows (sublanes) = B*W, lanes = H*Cin (Cin = 1).
    x_packed = jnp.transpose(x, (0, 2, 1)).reshape(B * W, H).astype(jnp.bfloat16)
    ops = [x_packed]
    dims = []
    h_in, w_in, c_in = H, W, 1
    s_prev = jnp.ones((1,), jnp.float32)     # running BN scale to fold into next weight
    t_prev = jnp.zeros((1,), jnp.float32)    # running additive constant (per channel)
    for i in range(num_cnn):
        wc = params[f"cnn{i}"]["w"].astype(jnp.float32)
        bc = params[f"cnn{i}"]["b"].astype(jnp.float32)
        c_out = wc.shape[0]
        h_o, w_o = h_in - 2, w_in - 2
        h_p, w_p = h_o - 2, (w_o - 3) // 2 + 1
        bn = params[f"bn{i}"]
        s = bn["gamma"].reshape(-1) * jax.lax.rsqrt(bn["var"].reshape(-1) + eps)
        t = bn["beta"].reshape(-1) - bn["mean"].reshape(-1) * s
        # Per-channel constant = conv(previous shift) + bias; constant within the 3x3
        # pool window, so it commutes with the maxpool and folds forward through BN.
        c_const = bc + jnp.einsum("oihw,i->o", wc, t_prev)
        ops += [
            _pack_conv_weight(wc, h_in, s_prev).astype(jnp.bfloat16),
            _make_sel(B, w_in, w_p, interleave=(i == num_cnn - 1)),
        ]
        dims.append((c_out, h_p * c_out))
        s_prev, t_prev = s, s * c_const + t
        h_in, w_in, c_in = h_p, w_p, c_out
    # Fuse BN2 + lin0 + lin1 (eval-mode dropout is identity, no nonlinearity between).
    w0 = params["lin0"]["w"].astype(jnp.float32)
    b0 = params["lin0"]["b"].astype(jnp.float32)
    w1 = params["lin1"]["w"].astype(jnp.float32)
    b1 = params["lin1"]["b"].astype(jnp.float32)
    n_out = w1.shape[0]
    w0r = w0.reshape(w0.shape[0], c_in, h_in, w_in)               # (m, c, h, w) torch order
    wc_tail = jnp.einsum("nm,mchw,c->whcn", w1, w0r, s_prev)
    wc_tail = wc_tail.reshape(w_in, h_in * c_in, n_out).astype(jnp.bfloat16)
    bc_tail = (w1 @ (b0 + jnp.einsum("mchw,c->m", w0r, t_prev)) + b1).reshape(1, n_out)
    ops += [wc_tail, bc_tail]

    def full_spec(a):
        nd = a.ndim
        return pl.BlockSpec(a.shape, lambda i, _nd=nd: (0,) * _nd)

    out = pl.pallas_call(
        functools.partial(_fused_kernel, dims=tuple(dims), w2=w_in, batch=B),
        out_shape=jax.ShapeDtypeStruct((B, n_out), jnp.float32),
        grid=(1,),
        in_specs=[full_spec(a) for a in ops],
        out_specs=pl.BlockSpec((B, n_out), lambda i: (0, 0)),
        compiler_params=pltpu.CompilerParams(dimension_semantics=("arbitrary",)),
    )(*ops)
    return out


# ---------------------------------------------------------------------------
# Deterministic synthetic parameters (shapes from the module defaults, output=6)
# ---------------------------------------------------------------------------
def init_params(key, output=6):
    conv_io = [[8, 16, 3, 0], [16, 8, 3, 0], [8, 4, 3, 0]]
    flat_num, linear_io = 192, [[0, 12], [12, 0]]
    ks = iter(jax.random.split(key, 32))
    params = {}
    for i, cfg in enumerate(conv_io):
        cin = 1 if i == 0 else cfg[0]
        cout, k = cfg[1], cfg[2]
        params[f"cnn{i}"] = {
            "w": 0.2 * jax.random.normal(next(ks), (cout, cin, k, k), jnp.float32),
            "b": 0.1 * jax.random.normal(next(ks), (cout,), jnp.float32),
        }
        params[f"bn{i}"] = {
            "gamma": 1.0 + 0.1 * jax.random.normal(next(ks), (1, cout), jnp.float32),
            "beta": 0.1 * jax.random.normal(next(ks), (1, cout), jnp.float32),
            "mean": 0.1 * jax.random.normal(next(ks), (1, cout), jnp.float32),
            "var": jax.random.uniform(next(ks), (1, cout), jnp.float32, 0.5, 1.5),
        }
    lin_shapes = [(linear_io[0][1], flat_num), (output, linear_io[1][0])]  # (out, in)
    for i, (o, n_in) in enumerate(lin_shapes):
        params[f"lin{i}"] = {
            "w": 0.1 * jax.random.normal(next(ks), (o, n_in), jnp.float32),
            "b": 0.1 * jax.random.normal(next(ks), (o,), jnp.float32),
        }
    return params


# ---------------------------------------------------------------------------
# Pure-JAX reference (numerical sanity check only)
# ---------------------------------------------------------------------------
def reference_forward(x, params):
    h = x[:, None, :, :]
    for i in range(3):
        cp, bp = params[f"cnn{i}"], params[f"bn{i}"]
        h = jax.lax.conv_general_dilated(
            h, cp["w"], (1, 1), "VALID",
            dimension_numbers=("NCHW", "OIHW", "NCHW")) + cp["b"][None, :, None, None]
        h = jax.lax.reduce_window(h, -jnp.inf, jax.lax.max,
                                  (1, 1, 3, 3), (1, 1, 1, 2), "VALID")
        inv = jax.lax.rsqrt(bp["var"] + 1e-5).reshape(1, -1, 1, 1)
        h = (h - bp["mean"].reshape(1, -1, 1, 1)) * inv * \
            bp["gamma"].reshape(1, -1, 1, 1) + bp["beta"].reshape(1, -1, 1, 1)
    h = h.reshape(h.shape[0], -1)
    for i in range(2):
        h = h @ params[f"lin{i}"]["w"].T + params[f"lin{i}"]["b"]
    return h


if __name__ == "__main__":
    key = jax.random.PRNGKey(0)
    kx, kp = jax.random.split(key)
    # (B, H, W) = (2, 20, 69) -> after 3x (conv3 valid + maxpool3 stride(1,2)):
    # (4, 8, 6) -> flattened 192 == flat_num default.
    B, H, W = 2, 20, 69
    x = jax.random.normal(kx, (B, H, W), dtype=jnp.float32)
    params = init_params(kp, output=6)

    fwd = jax.jit(classifier_cnn2d_forward)
    out = jax.block_until_ready(fwd(x, params))

    ref = jax.block_until_ready(reference_forward(x, params))
    err = float(jnp.max(jnp.abs(out - ref)))
    scale = float(jnp.max(jnp.abs(ref)))
    tol = 5e-2 * max(1.0, scale)
    if out.shape != (B, 6) or not (err <= tol):
        raise SystemExit(f"mismatch: shape={out.shape} max_err={err} scale={scale}")
    print("KERNEL_OK")
</pallas_src>

<mosaic_0001>
module attributes {stable_mosaic.version = 11 : i64} {
  func.func @_fused_kernel(%arg0: i32, %arg1: memref<138x20xbf16, #tpu.memory_space<vmem>>, %arg2: memref<60x288xbf16, #tpu.memory_space<vmem>>, %arg3: memref<66x134xf32, #tpu.memory_space<vmem>>, %arg4: memref<768x112xbf16, #tpu.memory_space<vmem>>, %arg5: memref<30x62xf32, #tpu.memory_space<vmem>>, %arg6: memref<288x40xbf16, #tpu.memory_space<vmem>>, %arg7: memref<12x26xf32, #tpu.memory_space<vmem>>, %arg8: memref<6x32x6xbf16, #tpu.memory_space<vmem>>, %arg9: memref<1x6xf32, #tpu.memory_space<vmem>>, %arg10: memref<2x6xf32, #tpu.memory_space<vmem>>) attributes {dimension_semantics = [#tpu.dimension_semantics<arbitrary>], iteration_bounds = array<i64: 1>, scalar_prefetch = 0 : i64, scratch_operands = 0 : i64, tpu.core_type = #tpu.core_type<tc>, window_params = [{pipeline_mode = #tpu.pipeline_mode<synchronous>, transform_indices = @transform_0, window_bounds = array<i64: 138, 20>}, {pipeline_mode = #tpu.pipeline_mode<synchronous>, transform_indices = @transform_1, window_bounds = array<i64: 60, 288>}, {pipeline_mode = #tpu.pipeline_mode<synchronous>, transform_indices = @transform_2, window_bounds = array<i64: 66, 134>}, {pipeline_mode = #tpu.pipeline_mode<synchronous>, transform_indices = @transform_3, window_bounds = array<i64: 768, 112>}, {pipeline_mode = #tpu.pipeline_mode<synchronous>, transform_indices = @transform_4, window_bounds = array<i64: 30, 62>}, {pipeline_mode = #tpu.pipeline_mode<synchronous>, transform_indices = @transform_5, window_bounds = array<i64: 288, 40>}, {pipeline_mode = #tpu.pipeline_mode<synchronous>, transform_indices = @transform_6, window_bounds = array<i64: 12, 26>}, {pipeline_mode = #tpu.pipeline_mode<synchronous>, transform_indices = @transform_7, window_bounds = array<i64: 6, 32, 6>}, {pipeline_mode = #tpu.pipeline_mode<synchronous>, transform_indices = @transform_8, window_bounds = array<i64: 1, 6>}, {pipeline_mode = #tpu.pipeline_mode<synchronous>, transform_indices = @transform_9, window_bounds = array<i64: 2, 6>}]} {
    %c0 = arith.constant 0 : index
    %c0_0 = arith.constant 0 : index
    %0 = vector.load %arg1[%c0, %c0_0] : memref<138x20xbf16, #tpu.memory_space<vmem>>, vector<138x20xbf16>
    %1 = vector.extract_strided_slice %0 {offsets = [0, 0], sizes = [136, 20], strides = [1, 1]} : vector<138x20xbf16> to vector<136x20xbf16>
    %2 = vector.extract_strided_slice %0 {offsets = [1, 0], sizes = [136, 20], strides = [1, 1]} : vector<138x20xbf16> to vector<136x20xbf16>
    %3 = vector.extract_strided_slice %0 {offsets = [2, 0], sizes = [136, 20], strides = [1, 1]} : vector<138x20xbf16> to vector<136x20xbf16>
    %4 = tpu.concatenate %1, %2, %3 in 1 : vector<136x20xbf16>, vector<136x20xbf16>, vector<136x20xbf16> -> vector<136x60xbf16>
    %c0_1 = arith.constant 0 : index
    %c0_2 = arith.constant 0 : index
    %5 = vector.load %arg2[%c0_1, %c0_2] : memref<60x288xbf16, #tpu.memory_space<vmem>>, vector<60x288xbf16>
    %cst = arith.constant dense<0.000000e+00> : vector<136x288xf32>
    %6 = tpu.matmul %4, %5, %cst {dimension_numbers = #tpu.dot_dimension_numbers<[1], [0], [0], [1], [0, 0, 1, 1], [], []>} : vector<136x60xbf16>, vector<60x288xbf16>, vector<136x288xf32> -> vector<136x288xf32>
    %7 = vector.extract_strided_slice %6 {offsets = [0, 0], sizes = [136, 256], strides = [1, 1]} : vector<136x288xf32> to vector<136x256xf32>
    %8 = vector.extract_strided_slice %6 {offsets = [0, 16], sizes = [136, 256], strides = [1, 1]} : vector<136x288xf32> to vector<136x256xf32>
    %9 = arith.maximumf %7, %8 : vector<136x256xf32>
    %10 = vector.extract_strided_slice %6 {offsets = [0, 32], sizes = [136, 256], strides = [1, 1]} : vector<136x288xf32> to vector<136x256xf32>
    %11 = arith.maximumf %9, %10 : vector<136x256xf32>
    %12 = vector.extract_strided_slice %11 {offsets = [0, 0], sizes = [134, 256], strides = [1, 1]} : vector<136x256xf32> to vector<134x256xf32>
    %13 = vector.extract_strided_slice %11 {offsets = [1, 0], sizes = [134, 256], strides = [1, 1]} : vector<136x256xf32> to vector<134x256xf32>
    %14 = arith.maximumf %12, %13 : vector<134x256xf32>
    %15 = vector.extract_strided_slice %11 {offsets = [2, 0], sizes = [134, 256], strides = [1, 1]} : vector<136x256xf32> to vector<134x256xf32>
    %16 = arith.maximumf %14, %15 : vector<134x256xf32>
    %c0_3 = arith.constant 0 : index
    %c0_4 = arith.constant 0 : index
    %17 = vector.load %arg3[%c0_3, %c0_4] : memref<66x134xf32, #tpu.memory_space<vmem>>, vector<66x134xf32>
    %cst_5 = arith.constant dense<0.000000e+00> : vector<66x256xf32>
    %18 = tpu.matmul %17, %16, %cst_5 {dimension_numbers = #tpu.dot_dimension_numbers<[1], [0], [0], [1], [0, 0, 1, 1], [], []>} : vector<66x134xf32>, vector<134x256xf32>, vector<66x256xf32> -> vector<66x256xf32>
    %19 = arith.truncf %18 : vector<66x256xf32> to vector<66x256xbf16>
    %20 = vector.extract_strided_slice %19 {offsets = [0, 0], sizes = [64, 256], strides = [1, 1]} : vector<66x256xbf16> to vector<64x256xbf16>
    %21 = vector.extract_strided_slice %19 {offsets = [1, 0], sizes = [64, 256], strides = [1, 1]} : vector<66x256xbf16> to vector<64x256xbf16>
    %22 = vector.extract_strided_slice %19 {offsets = [2, 0], sizes = [64, 256], strides = [1, 1]} : vector<66x256xbf16> to vector<64x256xbf16>
    %23 = tpu.concatenate %20, %21, %22 in 1 : vector<64x256xbf16>, vector<64x256xbf16>, vector<64x256xbf16> -> vector<64x768xbf16>
    %c0_6 = arith.constant 0 : index
    %c0_7 = arith.constant 0 : index
    %24 = vector.load %arg4[%c0_6, %c0_7] : memref<768x112xbf16, #tpu.memory_space<vmem>>, vector<768x112xbf16>
    %cst_8 = arith.constant dense<0.000000e+00> : vector<64x112xf32>
    %25 = tpu.matmul %23, %24, %cst_8 {dimension_numbers = #tpu.dot_dimension_numbers<[1], [0], [0], [1], [0, 0, 1, 1], [], []>} : vector<64x768xbf16>, vector<768x112xbf16>, vector<64x112xf32> -> vector<64x112xf32>
    %26 = vector.extract_strided_slice %25 {offsets = [0, 0], sizes = [64, 96], strides = [1, 1]} : vector<64x112xf32> to vector<64x96xf32>
    %27 = vector.extract_strided_slice %25 {offsets = [0, 8], sizes = [64, 96], strides = [1, 1]} : vector<64x112xf32> to vector<64x96xf32>
    %28 = arith.maximumf %26, %27 : vector<64x96xf32>
    %29 = vector.extract_strided_slice %25 {offsets = [0, 16], sizes = [64, 96], strides = [1, 1]} : vector<64x112xf32> to vector<64x96xf32>
    %30 = arith.maximumf %28, %29 : vector<64x96xf32>
    %31 = vector.extract_strided_slice %30 {offsets = [0, 0], sizes = [62, 96], strides = [1, 1]} : vector<64x96xf32> to vector<62x96xf32>
    %32 = vector.extract_strided_slice %30 {offsets = [1, 0], sizes = [62, 96], strides = [1, 1]} : vector<64x96xf32> to vector<62x96xf32>
    %33 = arith.maximumf %31, %32 : vector<62x96xf32>
    %34 = vector.extract_strided_slice %30 {offsets = [2, 0], sizes = [62, 96], strides = [1, 1]} : vector<64x96xf32> to vector<62x96xf32>
    %35 = arith.maximumf %33, %34 : vector<62x96xf32>
    %c0_9 = arith.constant 0 : index
    %c0_10 = arith.constant 0 : index
    %36 = vector.load %arg5[%c0_9, %c0_10] : memref<30x62xf32, #tpu.memory_space<vmem>>, vector<30x62xf32>
    %cst_11 = arith.constant dense<0.000000e+00> : vector<30x96xf32>
    %37 = tpu.matmul %36, %35, %cst_11 {dimension_numbers = #tpu.dot_dimension_numbers<[1], [0], [0], [1], [0, 0, 1, 1], [], []>} : vector<30x62xf32>, vector<62x96xf32>, vector<30x96xf32> -> vector<30x96xf32>
    %38 = arith.truncf %37 : vector<30x96xf32> to vector<30x96xbf16>
    %39 = vector.extract_strided_slice %38 {offsets = [0, 0], sizes = [28, 96], strides = [1, 1]} : vector<30x96xbf16> to vector<28x96xbf16>
    %40 = vector.extract_strided_slice %38 {offsets = [1, 0], sizes = [28, 96], strides = [1, 1]} : vector<30x96xbf16> to vector<28x96xbf16>
    %41 = vector.extract_strided_slice %38 {offsets = [2, 0], sizes = [28, 96], strides = [1, 1]} : vector<30x96xbf16> to vector<28x96xbf16>
    %42 = tpu.concatenate %39, %40, %41 in 1 : vector<28x96xbf16>, vector<28x96xbf16>, vector<28x96xbf16> -> vector<28x288xbf16>
    %c0_12 = arith.constant 0 : index
    %c0_13 = arith.constant 0 : index
    %43 = vector.load %arg6[%c0_12, %c0_13] : memref<288x40xbf16, #tpu.memory_space<vmem>>, vector<288x40xbf16>
    %cst_14 = arith.constant dense<0.000000e+00> : vector<28x40xf32>
    %44 = tpu.matmul %42, %43, %cst_14 {dimension_numbers = #tpu.dot_dimension_numbers<[1], [0], [0], [1], [0, 0, 1, 1], [], []>} : vector<28x288xbf16>, vector<288x40xbf16>, vector<28x40xf32> -> vector<28x40xf32>
    %45 = vector.extract_strided_slice %44 {offsets = [0, 0], sizes = [28, 32], strides = [1, 1]} : vector<28x40xf32> to vector<28x32xf32>
    %46 = vector.extract_strided_slice %44 {offsets = [0, 4], sizes = [28, 32], strides = [1, 1]} : vector<28x40xf32> to vector<28x32xf32>
    %47 = arith.maximumf %45, %46 : vector<28x32xf32>
    %48 = vector.extract_strided_slice %44 {offsets = [0, 8], sizes = [28, 32], strides = [1, 1]} : vector<28x40xf32> to vector<28x32xf32>
    %49 = arith.maximumf %47, %48 : vector<28x32xf32>
    %50 = vector.extract_strided_slice %49 {offsets = [0, 0], sizes = [26, 32], strides = [1, 1]} : vector<28x32xf32> to vector<26x32xf32>
    %51 = vector.extract_strided_slice %49 {offsets = [1, 0], sizes = [26, 32], strides = [1, 1]} : vector<28x32xf32> to vector<26x32xf32>
    %52 = arith.maximumf %50, %51 : vector<26x32xf32>
    %53 = vector.extract_strided_slice %49 {offsets = [2, 0], sizes = [26, 32], strides = [1, 1]} : vector<28x32xf32> to vector<26x32xf32>
    %54 = arith.maximumf %52, %53 : vector<26x32xf32>
    %c0_15 = arith.constant 0 : index
    %c0_16 = arith.constant 0 : index
    %55 = vector.load %arg7[%c0_15, %c0_16] : memref<12x26xf32, #tpu.memory_space<vmem>>, vector<12x26xf32>
    %cst_17 = arith.constant dense<0.000000e+00> : vector<12x32xf32>
    %56 = tpu.matmul %55, %54, %cst_17 {dimension_numbers = #tpu.dot_dimension_numbers<[1], [0], [0], [1], [0, 0, 1, 1], [], []>} : vector<12x26xf32>, vector<26x32xf32>, vector<12x32xf32> -> vector<12x32xf32>
    %57 = arith.truncf %56 : vector<12x32xf32> to vector<12x32xbf16>
    %58 = vector.extract_strided_slice %57 {offsets = [0, 0], sizes = [2, 32], strides = [1, 1]} : vector<12x32xbf16> to vector<2x32xbf16>
    %c0_18 = arith.constant 0 : index
    %c0_19 = arith.constant 0 : index
    %c0_20 = arith.constant 0 : index
    %59 = vector.load %arg8[%c0_18, %c0_19, %c0_20] : memref<6x32x6xbf16, #tpu.memory_space<vmem>>, vector<1x32x6xbf16>
    %60 = vector.shape_cast %59 : vector<1x32x6xbf16> to vector<32x6xbf16>
    %cst_21 = arith.constant dense<0.000000e+00> : vector<2x6xf32>
    %61 = tpu.matmul %58, %60, %cst_21 {dimension_numbers = #tpu.dot_dimension_numbers<[1], [0], [0], [1], [0, 0, 1, 1], [], []>} : vector<2x32xbf16>, vector<32x6xbf16>, vector<2x6xf32> -> vector<2x6xf32>
    %62 = vector.extract_strided_slice %57 {offsets = [2, 0], sizes = [2, 32], strides = [1, 1]} : vector<12x32xbf16> to vector<2x32xbf16>
    %c1 = arith.constant 1 : index
    %c0_22 = arith.constant 0 : index
    %c0_23 = arith.constant 0 : index
    %63 = vector.load %arg8[%c1, %c0_22, %c0_23] : memref<6x32x6xbf16, #tpu.memory_space<vmem>>, vector<1x32x6xbf16>
    %64 = vector.shape_cast %63 : vector<1x32x6xbf16> to vector<32x6xbf16>
    %cst_24 = arith.constant dense<0.000000e+00> : vector<2x6xf32>
    %65 = tpu.matmul %62, %64, %cst_24 {dimension_numbers = #tpu.dot_dimension_numbers<[1], [0], [0], [1], [0, 0, 1, 1], [], []>} : vector<2x32xbf16>, vector<32x6xbf16>, vector<2x6xf32> -> vector<2x6xf32>
    %66 = arith.addf %61, %65 : vector<2x6xf32>
    %67 = vector.extract_strided_slice %57 {offsets = [4, 0], sizes = [2, 32], strides = [1, 1]} : vector<12x32xbf16> to vector<2x32xbf16>
    %c2 = arith.constant 2 : index
    %c0_25 = arith.constant 0 : index
    %c0_26 = arith.constant 0 : index
    %68 = vector.load %arg8[%c2, %c0_25, %c0_26] : memref<6x32x6xbf16, #tpu.memory_space<vmem>>, vector<1x32x6xbf16>
    %69 = vector.shape_cast %68 : vector<1x32x6xbf16> to vector<32x6xbf16>
    %cst_27 = arith.constant dense<0.000000e+00> : vector<2x6xf32>
    %70 = tpu.matmul %67, %69, %cst_27 {dimension_numbers = #tpu.dot_dimension_numbers<[1], [0], [0], [1], [0, 0, 1, 1], [], []>} : vector<2x32xbf16>, vector<32x6xbf16>, vector<2x6xf32> -> vector<2x6xf32>
    %71 = arith.addf %66, %70 : vector<2x6xf32>
    %72 = vector.extract_strided_slice %57 {offsets = [6, 0], sizes = [2, 32], strides = [1, 1]} : vector<12x32xbf16> to vector<2x32xbf16>
    %c3 = arith.constant 3 : index
    %c0_28 = arith.constant 0 : index
    %c0_29 = arith.constant 0 : index
    %73 = vector.load %arg8[%c3, %c0_28, %c0_29] : memref<6x32x6xbf16, #tpu.memory_space<vmem>>, vector<1x32x6xbf16>
    %74 = vector.shape_cast %73 : vector<1x32x6xbf16> to vector<32x6xbf16>
    %cst_30 = arith.constant dense<0.000000e+00> : vector<2x6xf32>
    %75 = tpu.matmul %72, %74, %cst_30 {dimension_numbers = #tpu.dot_dimension_numbers<[1], [0], [0], [1], [0, 0, 1, 1], [], []>} : vector<2x32xbf16>, vector<32x6xbf16>, vector<2x6xf32> -> vector<2x6xf32>
    %76 = arith.addf %71, %75 : vector<2x6xf32>
    %77 = vector.extract_strided_slice %57 {offsets = [8, 0], sizes = [2, 32], strides = [1, 1]} : vector<12x32xbf16> to vector<2x32xbf16>
    %c4 = arith.constant 4 : index
    %c0_31 = arith.constant 0 : index
    %c0_32 = arith.constant 0 : index
    %78 = vector.load %arg8[%c4, %c0_31, %c0_32] : memref<6x32x6xbf16, #tpu.memory_space<vmem>>, vector<1x32x6xbf16>
    %79 = vector.shape_cast %78 : vector<1x32x6xbf16> to vector<32x6xbf16>
    %cst_33 = arith.constant dense<0.000000e+00> : vector<2x6xf32>
    %80 = tpu.matmul %77, %79, %cst_33 {dimension_numbers = #tpu.dot_dimension_numbers<[1], [0], [0], [1], [0, 0, 1, 1], [], []>} : vector<2x32xbf16>, vector<32x6xbf16>, vector<2x6xf32> -> vector<2x6xf32>
    %81 = arith.addf %76, %80 : vector<2x6xf32>
    %82 = vector.extract_strided_slice %57 {offsets = [10, 0], sizes = [2, 32], strides = [1, 1]} : vector<12x32xbf16> to vector<2x32xbf16>
    %c5 = arith.constant 5 : index
    %c0_34 = arith.constant 0 : index
    %c0_35 = arith.constant 0 : index
    %83 = vector.load %arg8[%c5, %c0_34, %c0_35] : memref<6x32x6xbf16, #tpu.memory_space<vmem>>, vector<1x32x6xbf16>
    %84 = vector.shape_cast %83 : vector<1x32x6xbf16> to vector<32x6xbf16>
    %cst_36 = arith.constant dense<0.000000e+00> : vector<2x6xf32>
    %85 = tpu.matmul %82, %84, %cst_36 {dimension_numbers = #tpu.dot_dimension_numbers<[1], [0], [0], [1], [0, 0, 1, 1], [], []>} : vector<2x32xbf16>, vector<32x6xbf16>, vector<2x6xf32> -> vector<2x6xf32>
    %86 = arith.addf %81, %85 : vector<2x6xf32>
    %c0_37 = arith.constant 0 : index
    %c0_38 = arith.constant 0 : index
    %87 = vector.load %arg9[%c0_37, %c0_38] : memref<1x6xf32, #tpu.memory_space<vmem>>, vector<1x6xf32>
    %88 = vector.broadcast %87 : vector<1x6xf32> to vector<2x6xf32>
    %89 = arith.addf %86, %88 : vector<2x6xf32>
    %c0_39 = arith.constant 0 : index
    %c0_40 = arith.constant 0 : index
    %90 = vector.load %arg10[%c0_39, %c0_40] : memref<2x6xf32, #tpu.memory_space<vmem>>, vector<2x6xf32>
    tpu.vector_store %arg10[%c0_39, %c0_40], %89 {strides = array<i32>} : memref<2x6xf32, #tpu.memory_space<vmem>>, vector<2x6xf32>,
    return
  }
  func.func @transform_0(%arg0: i32) -> (i32, i32) {
    %c0_i32 = arith.constant 0 : i32
    %c0_i32_0 = arith.constant 0 : i32
    %c0_i32_1 = arith.constant 0 : i32
    return %c0_i32, %c0_i32_0 : i32, i32
  }
  func.func @transform_1(%arg0: i32) -> (i32, i32) {
    %c0_i32 = arith.constant 0 : i32
    %c0_i32_0 = arith.constant 0 : i32
    %c0_i32_1 = arith.constant 0 : i32
    return %c0_i32, %c0_i32_0 : i32, i32
  }
  func.func @transform_2(%arg0: i32) -> (i32, i32) {
    %c0_i32 = arith.constant 0 : i32
    %c0_i32_0 = arith.constant 0 : i32
    %c0_i32_1 = arith.constant 0 : i32
    return %c0_i32, %c0_i32_0 : i32, i32
  }
  func.func @transform_3(%arg0: i32) -> (i32, i32) {
    %c0_i32 = arith.constant 0 : i32
    %c0_i32_0 = arith.constant 0 : i32
    %c0_i32_1 = arith.constant 0 : i32
    return %c0_i32, %c0_i32_0 : i32, i32
  }
  func.func @transform_4(%arg0: i32) -> (i32, i32) {
    %c0_i32 = arith.constant 0 : i32
    %c0_i32_0 = arith.constant 0 : i32
    %c0_i32_1 = arith.constant 0 : i32
    return %c0_i32, %c0_i32_0 : i32, i32
  }
  func.func @transform_5(%arg0: i32) -> (i32, i32) {
    %c0_i32 = arith.constant 0 : i32
    %c0_i32_0 = arith.constant 0 : i32
    %c0_i32_1 = arith.constant 0 : i32
    return %c0_i32, %c0_i32_0 : i32, i32
  }
  func.func @transform_6(%arg0: i32) -> (i32, i32) {
    %c0_i32 = arith.constant 0 : i32
    %c0_i32_0 = arith.constant 0 : i32
    %c0_i32_1 = arith.constant 0 : i32
    return %c0_i32, %c0_i32_0 : i32, i32
  }
  func.func @transform_7(%arg0: i32) -> (i32, i32, i32) {
    %c0_i32 = arith.constant 0 : i32
    %c0_i32_0 = arith.constant 0 : i32
    %c0_i32_1 = arith.constant 0 : i32
    %c0_i32_2 = arith.constant 0 : i32
    return %c0_i32, %c0_i32_0, %c0_i32_1 : i32, i32, i32
  }
  func.func @transform_8(%arg0: i32) -> (i32, i32) {
    %c0_i32 = arith.constant 0 : i32
    %c0_i32_0 = arith.constant 0 : i32
    %c0_i32_1 = arith.constant 0 : i32
    return %c0_i32, %c0_i32_0 : i32, i32
  }
  func.func @transform_9(%arg0: i32) -> (i32, i32) {
    %c0_i32 = arith.constant 0 : i32
    %c0_i32_0 = arith.constant 0 : i32
    %c0_i32_1 = arith.constant 0 : i32
    return %c0_i32, %c0_i32_0 : i32, i32
  }
}

</mosaic_0001>

<bundles_post_ra>
// kernel: classifier_cnn2d_forward.1
= control target key start
LH: loop header
LB: loop body
LE: loop exit
PB: predicated region body
PF: predicated region fallthrough
CT: control target
= control target key end

     0   :  { %vm98_vm0 = vsmask.f32 7424  ;;  %vm188_vm1 = vcmask 1046528   ;;  %s3961_s21 = smov 20   ;;  %vm359_vm2 = vcmask 1045504   ;;  %s3962_s28 = smov 40   ;;  %s5601_s0 = inlined_call_operand.vmem [shape: bf16[138,20], index: 0, kind: input, shape index: {}]   ;;  %s5602_s1 = inlined_call_operand.vmem [shape: bf16[60,288], index: 1, kind: input, shape index: {}]   ;;  %s5603_s2 = inlined_call_operand.vmem [shape: f32[66,134], index: 2, kind: input, shape index: {}]   ;;  %s5604_s3 = inlined_call_operand.vmem [shape: bf16[768,112], index: 3, kind: input, shape index: {}]   ;;  %s5605_s4 = inlined_call_operand.vmem [shape: f32[30,62], index: 4, kind: input, shape index: {}]   ;;  %s5606_s5 = inlined_call_operand.vmem [shape: bf16[288,40], index: 5, kind: input, shape index: {}]   ;;  %s5607_s6 = inlined_call_operand.vmem [shape: f32[12,26], index: 6, kind: input, shape index: {}]   ;;  %s5608_s7 = inlined_call_operand.vmem [shape: bf16[6,32,6], index: 7, kind: input, shape index: {}]   ;;  %s5609_s8 = inlined_call_operand.vmem [shape: f32[1,6], index: 8, kind: input, shape index: {}]   ;;  %s5610_s9 = inlined_call_operand.hbm [shape: f32[2,6], index: 9, kind: output, shape index: {}]  }
   0x1   :  { %v4025_v0 = vld [vmem:[%s5601_s0] sm:$0xff]   ;;  %v4030_v1 = vld [vmem:[%s5601_s0 + $0x8] sm:$0xff]   ;;  %v4035_v2 = vld [vmem:[%s5601_s0 + $0x10] sm:$0xff]   ;;  %v5611_v43 = vmov 0.0   ;;  %vm3965_vm3 = vmmov 0  }
   0x2   :  { %v100_v3 = vshrl.u32 %v4025_v0, 16  ;;  %v102_v4 = vshll.u32 %v4025_v0, 16  ;;  %v107_v5 = vshll.u32 %v4030_v1, 16  ;;  %v189_v6 = vrot.slane %v4025_v0, 1  ;;  %v4048_v13 = vld [vmem:[%s5601_s0 + $0x18] sm:$0xff]   ;;  %v4053_v15 = vld [vmem:[%s5601_s0 + $0x20] sm:$0xff]   ;;  %3691 = vmatprep.subr.bf16.mxu1 %v5611_v43  ;;  %3699 = vmatprep.mubr.msk.bf16.mxu1 %vm3965_vm3, %v5611_v43 }
   0x3   :  { %v190_v7 = vrot.slane %v4030_v1, 1  ;;  %v111_v8 = vshrl.u32 %v4030_v1, 16  ;;  %v115_v9 = vshll.u32 %v4035_v2, 16  ;;  %v192_v12 = vrot.slane %v4035_v2, 1  ;;  %v4063_v23 = vld [vmem:[%s5601_s0 + $0x28] sm:$0xff]   ;;  %v4074_v30 = vld [vmem:[%s5601_s0 + $0x30] sm:$0xff]  }
   0x4   :  { %v104_v10 = vrot.slane %v102_v4, 1  ;;  %v109_v11 = vrot.slane %v107_v5, 1  ;;  %v119_v18 = vshrl.u32 %v4035_v2, 16  ;;  %v123_v19 = vshll.u32 %v4048_v13, 16  ;;  %v3846_v39 = vld [vmem:[%s5602_s1 + $0x34] ss:$12 sps:$4 sm:$0xff]  }
   0x5   :  { %v117_v14 = vrot.slane %v115_v9, 1  ;;  %v131_v20 = vshll.u32 %v4053_v15, 16  ;;  %v194_v24 = vrot.slane %v4048_v13, 1  ;;  %v127_v25 = vshrl.u32 %v4048_v13, 16  ;;  %v3848_v46 = vld [vmem:[%s5602_s1 + $0x30] ss:$12 sps:$4 sm:$0xff]  }
   0x6   :  { %v105_v16 = vor.u32 %v104_v10, %v100_v3  ;;  %v113_v17 = vor.u32 %v111_v8, %v109_v11  ;;  %v191_v26 = vsel %vm188_vm1, %v189_v6, %v190_v7  ;;  %v193_v27 = vsel %vm188_vm1, %v190_v7, %v192_v12  ;;  %v3842_v31 = vld [vmem:[%s5602_s1 + $0x4c] ss:$12 sps:$4 sm:$0x3f]   ;;  %v3844_v35 = vld [vmem:[%s5602_s1 + $0x48] ss:$12 sps:$4 sm:$0x3f]  }
   0x7   :  { %v121_v28 = vor.u32 %v119_v18, %v117_v14  ;;  %v125_v29 = vrot.slane %v123_v19, 1  ;;  %v133_v32 = vrot.slane %v131_v20, 1  ;;  %v196_v33 = vrot.slane %v4053_v15, 1  ;;  %v3845_v38 = vld [vmem:[%s5602_s1 + $0x50] ss:$12 sps:$4 sm:$0x3f]   ;;  %3345 = vmatprep.subr.msk.bf16.mxu0 %vm359_vm2, %v3842_v31 }
   0x8   :  { %v110_v21 = vsel %vm98_vm0, %v105_v16, %v109_v11  ;;  %v118_v22 = vsel %vm98_vm0, %v113_v17, %v117_v14  ;;  %v135_v34 = vshrl.u32 %v4053_v15, 16  ;;  %v195_v36 = vsel %vm188_vm1, %v192_v12, %v194_v24  ;;  %v3849_v47 = vld [vmem:[%s5602_s1 + $0x38] ss:$12 sps:$4 sm:$0xff]   ;;  %v3850_v48 = vld [vmem:[%s5602_s1 + $0x1c] ss:$12 sps:$4 sm:$0xff]  }
   0x9   :  { %170 = vrot.lane.b32.xlu0 %v110_v21, %s3961_s21  ;;  %172 = vrot.lane.b32.xlu1 %v118_v22, %s3961_s21  ;;  %v139_v37 = vshll.u32 %v4063_v23, 16  ;;  %v126_v40 = vsel %vm98_vm0, %v121_v28, %v125_v29  ;;  %v129_v41 = vor.u32 %v127_v25, %v125_v29  ;;  %v147_v42 = vshll.u32 %v4074_v30, 16  ;;  %v3852_v51 = vld [vmem:[%s5602_s1 + $0x18] ss:$12 sps:$4 sm:$0xff]   ;;  %v3853_v58 = vld [vmem:[%s5602_s1 + $0x20] ss:$12 sps:$4 sm:$0xff]  }
   0xa   :  { %v361_v44 = vsel %vm359_vm2, %v3844_v35, 0  ;;  %v367_v45 = vsel %vm359_vm2, %v3845_v38, 0  ;;  %v198_v49 = vrot.slane %v4063_v23, 1  ;;  %v143_v50 = vshrl.u32 %v4063_v23, 16  ;;  %v4122_v56 = vld [vmem:[%s5601_s0 + $0x38] sm:$0xff]  }
   0xb   :  { %378 = vmatpush1.bf16.msra.mxu0 %v361_v44  ;;  %3692 = vmatpush3.bf16.msra.mxu1 %v367_v45  ;;  %v134_v52 = vsel %vm98_vm0, %v129_v41, %v133_v32  ;;  %v197_v53 = vsel %vm188_vm1, %v194_v24, %v196_v33  ;;  %v137_v54 = vor.u32 %v135_v34, %v133_v32  ;;  %v141_v55 = vrot.slane %v139_v37, 1  ;;  %v3855_v60 = vld [vmem:[%s5602_s1 + $0x4] ss:$12 sps:$4 sm:$0xff]   ;;  %v3857_v63 = vld [vmem:[%s5602_s1] ss:$12 sps:$4 sm:$0xff]  }
   0xc   :  { %379 = vmatprep.subr.bf16.mxu0 %v3846_v39  ;;  %3693 = vmatprep.subr.bf16.mxu1 %v5611_v43  ;;  %v200_v57 = vrot.slane %v4074_v30, 1  ;;  %v149_v59 = vrot.slane %v147_v42, 1  ;;  %v151_v61 = vshrl.u32 %v4074_v30, 16  ;;  %v155_v62 = vshll.u32 %v4122_v56, 16  ;;  %v3858_v6 = vld [vmem:[%s5602_s1 + $0x8] ss:$12 sps:$4 sm:$0xff]  }
   0xd   :  { %206 = vrot.lane.b32.xlu0 %v191_v26, %s3962_s28  ;;  %208 = vrot.lane.b32.xlu1 %v193_v27, %s3962_s28  ;;  %v142_v3 = vsel %vm98_vm0, %v137_v54, %v141_v55  ;;  %v199_v4 = vsel %vm188_vm1, %v196_v33, %v198_v49  ;;  %v145_v5 = vor.u32 %v143_v50, %v141_v55  ;;  %v3964_v7 = vmov 0   ;;  %v4148_v8 = vld [vmem:[%s5601_s0 + $0x40] sm:$0xf]  ;;  %v51_v9 = vld [vmem:[%s5601_s0 + $0x44] sm:$0x1] }
   0xe   :  { %401 = vmatprep.mubr.bf16.mxu0 %v3964_v7  ;;  %v3332_v10 = vcombine.low %v4148_v8, %v51_v9  ;;  %v157_v11 = vrot.slane %v155_v62, 1  ;;  %v202_v12 = vrot.slane %v4122_v56, 1  ;;  %v159_v14 = vshrl.u32 %v4122_v56, 16 }
   0xf   :  { %380 = vmatpush1.bf16.msra.mxu0 %v3848_v46  ;;  %3694 = vmatpush3.bf16.msra.mxu1 %v3849_v47  ;;  %v150_v17 = vsel %vm98_vm0, %v145_v5, %v149_v59  ;;  %v201_v18 = vsel %vm188_vm1, %v198_v49, %v200_v57  ;;  %v153_v19 = vor.u32 %v151_v61, %v149_v59 }
  0x10   :  { %381 = vmatprep.subr.bf16.mxu0 %v3850_v48  ;;  %3695 = vmatprep.subr.bf16.mxu1 %v5611_v43  ;;  %v163_v16 = vshll.u32 %v3332_v10, 16  ;;  %v204_v21 = vrot.slane %v3332_v10, 1  ;;  %v203_v24 = vsel %vm188_vm1, %v200_v57, %v202_v12  ;;  %v161_v25 = vor.u32 %v159_v14, %v157_v11 }
  0x11   :  { %174 = vrot.lane.b32.xlu0 %v126_v40, %s3961_s21  ;;  %210 = vrot.lane.b32.xlu1 %v195_v36, %s3962_s28  ;;  %v158_v22 = vsel %vm98_vm0, %v153_v19, %v157_v11  ;;  %v167_v26 = vshrl.u32 %v3332_v10, 16 }
  0x12   :  { %v165_v20 = vrot.slane %v163_v16, 1  ;;  %v205_v28 = vsel %vm188_vm1, %v202_v12, %v204_v21 }
  0x13   :  { %382 = vmatpush1.bf16.msra.mxu0 %v3852_v51  ;;  %3696 = vmatpush3.bf16.msra.mxu1 %v3853_v58 }
  0x14   :  { %383 = vmatprep.subr.bf16.mxu0 %v3855_v60  ;;  %3697 = vmatprep.subr.bf16.mxu1 %v5611_v43  ;;  %v166_v27 = vsel %vm98_vm0, %v161_v25, %v165_v20  ;;  %v169_v29 = vor.u32 %v167_v26, %v165_v20 }
  0x15   :  { %176 = vrot.lane.b32.xlu0 %v134_v52, %s3961_s21  ;;  %212 = vrot.lane.b32.xlu1 %v197_v53, %s3962_s28 }
  0x17   :  { %384 = vmatpush1.bf16.msra.mxu0 %v3857_v63  ;;  %3698 = vmatpush3.bf16.msra.mxu1 %v3858_v6 }
  0x19   :  { %178 = vrot.lane.b32.xlu0 %v142_v3, %s3961_s21  ;;  %214 = vrot.lane.b32.xlu1 %v199_v4, %s3962_s28 }
  0x1d   :  { %180 = vrot.lane.b32.xlu0 %v150_v17, %s3961_s21  ;;  %216 = vrot.lane.b32.xlu1 %v201_v18, %s3962_s28 }
  0x21   :  { %182 = vrot.lane.b32.xlu0 %v158_v22, %s3961_s21  ;;  %218 = vrot.lane.b32.xlu1 %v203_v24, %s3962_s28 }
  0x25   :  { %184 = vrot.lane.b32.xlu0 %v166_v27, %s3961_s21  ;;  %220 = vrot.lane.b32.xlu1 %v205_v28, %s3962_s28 }
  0x29   :  { %186 = vrot.lane.b32.xlu0 %v169_v29, %s3961_s21  ;;  %222 = vrot.lane.b32.xlu1 %v204_v21, %s3962_s28 }
  0x2a   :  { %14 = vsyncpa [#allocation3], 0  ;;  %vm224_vm4 = vcmask 162816   ;;  %vm244_vm5 = vcmask 326656   ;;  %vm340_vm6 = vcmask 490496   ;;  %v3331_v53 = vcombine.low %v4148_v8, %v4148_v8  ;;  %s3966_s0 = smov 112  }
  0x2b   :  { %s3967_s1 = smov 96   ;;  %vm747_vm7 = vcmask 916480   ;;  %vm952_vm8 = vcmask 785408   ;;  %vm1376_vm9 = vcmask 48128   ;;  %vm2380_vm10 = vcmask 506880   ;;  %s3969_s14 = smov 64  }
  0x2c   :  { %vm2668_vm11 = vcmask 261120   ;;  %vm2517_vm12 = vcmask 523264   ;;  %vm2843_vm13 = vcmask 211968   ;;  %vm2850_vm14 = vcmask 1041408   ;;  %s3971_s21 = smov [#allocation2]  }
  0x2d   :  { %vm3307_vm15 = vcmask 41984  }
  0x7b   :  { %v171_v31 = vpop.permute.xlu0 %170  ;;  %v173_v32 = vpop.permute.xlu1 %172 }
  0x7c   :  { %v226_v33 = vsel %vm224_vm4, %v4025_v0, %v171_v31  ;;  %v228_v39 = vsel %vm224_vm4, %v4030_v1, %v173_v32 }
  0x7f   :  { %v207_v34 = vpop.permute.xlu0 %206  ;;  %v209_v35 = vpop.permute.xlu1 %208 }
  0x80   :  { %v246_v36 = vsel %vm244_vm5, %v226_v33, %v207_v34  ;;  %v248_v41 = vsel %vm244_vm5, %v228_v39, %v209_v35 }
  0x81   :  { %3346 = vmatmul.mubr.msk.bf16.vlgmr.msra.gmra.mxu0 %vm340_vm6, %v246_v36  ;;  %3700 = vmatmul.mubr.msk.bf16.vlgmr.msra.gmra.mxu1 %vm340_vm6, %v246_v36 }
  0x82   :  { %411 = vmatprep.mubr.bf16.mxu0 %v3964_v7  ;;  %3703 = vmatprep.mubr.msk.bf16.mxu1 %vm3965_vm3, %v5611_v43 }
  0x83   :  { %v175_v37 = vpop.permute.xlu0 %174  ;;  %v211_v38 = vpop.permute.xlu1 %210 }
  0x84   :  { %v230_v42 = vsel %vm224_vm4, %v4035_v2, %v175_v37 }
  0x85   :  { %v250_v1 = vsel %vm244_vm5, %v230_v42, %v211_v38 }
  0x87   :  { %v177_v40 = vpop.permute.xlu0 %176  ;;  %v213_v0 = vpop.permute.xlu1 %212 }
  0x88   :  { %v232_v48 = vsel %vm224_vm4, %v4048_v13, %v177_v40 }
  0x89   :  { %3347 = vmatmul.mubr.msk.bf16.gmra.mxu0 %vm340_vm6, %v248_v41  ;;  %3704 = vmatmul.mubr.msk.bf16.gmra.mxu1 %vm340_vm6, %v248_v41  ;;  %v252_v50 = vsel %vm244_vm5, %v232_v48, %v213_v0 }
  0x8a   :  { %421 = vmatprep.mubr.bf16.mxu0 %v3964_v7  ;;  %3707 = vmatprep.mubr.msk.bf16.mxu1 %vm3965_vm3, %v5611_v43 }
  0x8b   :  { %v179_v44 = vpop.permute.xlu0 %178  ;;  %v215_v45 = vpop.permute.xlu1 %214 }
  0x8c   :  { %v234_v13 = vsel %vm224_vm4, %v4053_v15, %v179_v44 }
  0x8d   :  { %v254_v59 = vsel %vm244_vm5, %v234_v13, %v215_v45 }
  0x8f   :  { %v181_v46 = vpop.permute.xlu0 %180  ;;  %v217_v47 = vpop.permute.xlu1 %216 }
  0x90   :  { %v236_v15 = vsel %vm224_vm4, %v4063_v23, %v181_v46 }
  0x91   :  { %3348 = vmatmul.mubr.msk.bf16.gmra.mxu0 %vm340_vm6, %v250_v1  ;;  %3708 = vmatmul.mubr.msk.bf16.gmra.mxu1 %vm340_vm6, %v250_v1  ;;  %v256_v60 = vsel %vm244_vm5, %v236_v15, %v217_v47 }
  0x92   :  { %431 = vmatprep.mubr.bf16.mxu0 %v3964_v7  ;;  %3711 = vmatprep.mubr.msk.bf16.mxu1 %vm3965_vm3, %v5611_v43 }
  0x93   :  { %v183_v49 = vpop.permute.xlu0 %182  ;;  %v219_v2 = vpop.permute.xlu1 %218 }
  0x94   :  { %v238_v61 = vsel %vm224_vm4, %v4074_v30, %v183_v49 }
  0x95   :  { %v258_v62 = vsel %vm244_vm5, %v238_v61, %v219_v2 }
  0x97   :  { %v185_v51 = vpop.permute.xlu0 %184  ;;  %v221_v52 = vpop.permute.xlu1 %220 }
  0x98   :  { %v240_v23 = vsel %vm224_vm4, %v4122_v56, %v185_v51 }
  0x99   :  { %3349 = vmatmul.mubr.msk.bf16.gmra.mxu0 %vm340_vm6, %v252_v50  ;;  %3712 = vmatmul.mubr.msk.bf16.gmra.mxu1 %vm340_vm6, %v252_v50  ;;  %v260_v63 = vsel %vm244_vm5, %v240_v23, %v221_v52 }
  0x9a   :  { %441 = vmatprep.mubr.bf16.mxu0 %v3964_v7  ;;  %3715 = vmatprep.mubr.msk.bf16.mxu1 %vm3965_vm3, %v5611_v43 }
  0x9b   :  { %v187_v54 = vpop.permute.xlu0 %186  ;;  %v223_v55 = vpop.permute.xlu1 %222 }
  0x9c   :  { %v243_v57 = vsel %vm224_vm4, %v3331_v53, %v187_v54 }
  0x9d   :  { %v262_v58 = vsel %vm244_vm5, %v243_v57, %v223_v55 }
  0xa1   :  { %3350 = vmatmul.mubr.msk.bf16.gmra.mxu0 %vm340_vm6, %v254_v59  ;;  %3716 = vmatmul.mubr.msk.bf16.gmra.mxu1 %vm340_vm6, %v254_v59 }
  0xa2   :  { %451 = vmatprep.mubr.bf16.mxu0 %v3964_v7  ;;  %3719 = vmatprep.mubr.msk.bf16.mxu1 %vm3965_vm3, %v5611_v43 }
  0xa9   :  { %3351 = vmatmul.mubr.msk.bf16.gmra.mxu0 %vm340_vm6, %v256_v60  ;;  %3720 = vmatmul.mubr.msk.bf16.gmra.mxu1 %vm340_vm6, %v256_v60 }
  0xaa   :  { %461 = vmatprep.mubr.bf16.mxu0 %v3964_v7  ;;  %3723 = vmatprep.mubr.msk.bf16.mxu1 %vm3965_vm3, %v5611_v43 }
  0xb1   :  { %3352 = vmatmul.mubr.msk.bf16.gmra.mxu0 %vm340_vm6, %v258_v62  ;;  %3724 = vmatmul.mubr.msk.bf16.gmra.mxu1 %vm340_vm6, %v258_v62 }
  0xb2   :  { %471 = vmatprep.mubr.bf16.mxu0 %v3964_v7  ;;  %3727 = vmatprep.mubr.msk.bf16.mxu1 %vm3965_vm3, %v5611_v43 }
  0xb9   :  { %3353 = vmatmul.mubr.msk.bf16.gmra.mxu0 %vm340_vm6, %v260_v63  ;;  %3728 = vmatmul.mubr.msk.bf16.gmra.mxu1 %vm340_vm6, %v260_v63 }
  0xba   :  { %481 = vmatprep.mubr.bf16.mxu0 %v3964_v7  ;;  %3731 = vmatprep.mubr.msk.bf16.mxu1 %vm3965_vm3, %v5611_v43 }
  0xc1   :  { %3354 = vmatmul.mubr.msk.bf16.gmra.mxu0 %vm340_vm6, %v262_v58  ;;  %3732 = vmatmul.mubr.msk.bf16.gmra.mxu1 %vm340_vm6, %v262_v58 }
 0x141   :  { %v4245_v30 = vpop.f32.mrf.mxu0  ;;  %v4247_v3 = vpop.f32.mrf.mxu1 }
 0x142   :  { %5643 = vst [vmem:[#allocation5_spill] sm:$0xff] %v4245_v30 }
 0x143   :  { %v4249_v56 = vpop.f32.mrf.mxu0  ;;  %v3701_v4 = vpop.f32.mrf.mxu1 }
 0x144   :  { %5644 = vst [vmem:[#allocation6_spill] sm:$0xff] %v4249_v56 }
 0x145   :  { %v4251_v5 = vpop.f32.mrf.mxu0  ;;  %v4253_v6 = vpop.f32.mrf.mxu1 }
 0x146   :  { %5645 = vst [vmem:[#allocation7_spill] sm:$0xff] %v4251_v5 }
 0x147   :  { %v4255_v8 = vpop.f32.mrf.mxu0  ;;  %v3702_v7 = vpop.f32.mrf.mxu1 }
 0x148   :  { %5646 = vst [vmem:[#allocation8_spill] sm:$0xff] %v4255_v8 }
 0x149   :  { %v4257_v9 = vpop.f32.mrf.mxu0  ;;  %v4259_v10 = vpop.f32.mrf.mxu1 }
 0x14a   :  { %661 = vrot.lane.b32.xlu0 %v4259_v10, %s3966_s0  ;;  %657 = vrot.lane.b32.xlu1 %v4257_v9, %s3966_s0 }
 0x14b   :  { %v4265_v11 = vpop.f32.mrf.mxu0  ;;  %v3705_v12 = vpop.f32.mrf.mxu1 }
 0x14d   :  { %v4267_v14 = vpop.f32.mrf.mxu0  ;;  %v535_v16 = vpop.f32.mrf.mxu1 }
 0x14e   :  { %667 = vrot.lane.b32.xlu0 %v535_v16, %s3966_s0  ;;  %659 = vrot.lane.b32.xlu1 %v4265_v11, %s3966_s0 }
 0x14f   :  { %v4272_v17 = vpop.f32.mrf.mxu0  ;;  %v3706_v18 = vpop.f32.mrf.mxu1 }
 0x151   :  { %v4274_v19 = vpop.f32.mrf.mxu0  ;;  %v540_v20 = vpop.f32.mrf.mxu1 }
 0x152   :  { %872 = vrot.lane.b32.xlu0 %v535_v16, %s3967_s1  ;;  %663 = vrot.lane.b32.xlu1 %v4267_v14, %s3966_s0 }
 0x153   :  { %v4279_v21 = vpop.f32.mrf.mxu0  ;;  %v3709_v22 = vpop.f32.mrf.mxu1 }
 0x155   :  { %v4281_v24 = vpop.f32.mrf.mxu0  ;;  %v543_v25 = vpop.f32.mrf.mxu1 }
 0x156   :  { %665 = vrot.lane.b32.xlu1 %v4272_v17, %s3966_s0  ;;  %673 = vrot.lane.b32.xlu0 %v540_v20, %s3966_s0 }
 0x157   :  { %v4286_v26 = vpop.f32.mrf.mxu0  ;;  %v3710_v27 = vpop.f32.mrf.mxu1 }
 0x159   :  { %v4288_v28 = vpop.f32.mrf.mxu0  ;;  %v548_v29 = vpop.f32.mrf.mxu1 }
 0x15a   :  { %5647 = vst [vmem:[#allocation9_spill] sm:$0xff] %v4288_v28  ;;  %870 = vrot.lane.b32.xlu1 %v4272_v17, %s3967_s1  ;;  %878 = vrot.lane.b32.xlu0 %v540_v20, %s3967_s1 }
 0x15b   :  { %v4293_v31 = vpop.f32.mrf.mxu0  ;;  %v3713_v32 = vpop.f32.mrf.mxu1 }
 0x15c   :  { %5648 = vst [vmem:[#allocation10_spill] sm:$0xff] %v4293_v31 }
 0x15d   :  { %v4295_v33 = vpop.f32.mrf.mxu0  ;;  %v551_v34 = vpop.f32.mrf.mxu1 }
 0x15e   :  { %874 = vrot.lane.b32.xlu0 %v4274_v19, %s3967_s1  ;;  %669 = vrot.lane.b32.xlu1 %v4274_v19, %s3966_s0 }
 0x15f   :  { %v4301_v35 = vpop.f32.mrf.mxu0  ;;  %v3714_v36 = vpop.f32.mrf.mxu1 }
 0x161   :  { %v4303_v37 = vpop.f32.mrf.mxu0  ;;  %v556_v38 = vpop.f32.mrf.mxu1 }
 0x162   :  { %679 = vrot.lane.b32.xlu0 %v543_v25, %s3966_s0  ;;  %671 = vrot.lane.b32.xlu1 %v4279_v21, %s3966_s0 }
 0x163   :  { %v4308_v39 = vpop.f32.mrf.mxu0  ;;  %v3717_v40 = vpop.f32.mrf.mxu1 }
 0x165   :  { %v4310_v0 = vpop.f32.mrf.mxu0  ;;  %v559_v41 = vpop.f32.mrf.mxu1 }
 0x166   :  { %884 = vrot.lane.b32.xlu0 %v543_v25, %s3967_s1  ;;  %876 = vrot.lane.b32.xlu1 %v4279_v21, %s3967_s1 }
 0x167   :  { %v4315_v42 = vpop.f32.mrf.mxu0  ;;  %v3718_v44 = vpop.f32.mrf.mxu1 }
 0x169   :  { %v4317_v45 = vpop.f32.mrf.mxu0  ;;  %v564_v1 = vpop.f32.mrf.mxu1 }
 0x16a   :  { %880 = vrot.lane.b32.xlu0 %v4281_v24, %s3967_s1  ;;  %675 = vrot.lane.b32.xlu1 %v4281_v24, %s3966_s0 }
 0x16b   :  { %v4323_v46 = vpop.f32.mrf.mxu0  ;;  %v3721_v47 = vpop.f32.mrf.mxu1 }
 0x16d   :  { %v4325_v48 = vpop.f32.mrf.mxu0  ;;  %v567_v49 = vpop.f32.mrf.mxu1 }
 0x16e   :  { %677 = vrot.lane.b32.xlu1 %v4286_v26, %s3966_s0  ;;  %685 = vrot.lane.b32.xlu0 %v548_v29, %s3966_s0 }
 0x16f   :  { %v4330_v2 = vpop.f32.mrf.mxu0  ;;  %v3722_v50 = vpop.f32.mrf.mxu1 }
 0x171   :  { %v4332_v51 = vpop.f32.mrf.mxu0  ;;  %v572_v52 = vpop.f32.mrf.mxu1 }
 0x172   :  { %882 = vrot.lane.b32.xlu1 %v4286_v26, %s3967_s1  ;;  %890 = vrot.lane.b32.xlu0 %v548_v29, %s3967_s1 }
 0x173   :  { %v4337_v53 = vpop.f32.mrf.mxu0  ;;  %v3725_v13 = vpop.f32.mrf.mxu1 }
 0x175   :  { %v4339_v54 = vpop.f32.mrf.mxu0  ;;  %v4341_v55 = vpop.f32.mrf.mxu1 }
 0x176   :  { %5649 = vst [vmem:[#allocation11_spill] sm:$0xff] %v4339_v54  ;;  %886 = vrot.lane.b32.xlu0 %v4288_v28, %s3967_s1  ;;  %681 = vrot.lane.b32.xlu1 %v4288_v28, %s3966_s0 }
 0x177   :  { %v4347_v57 = vpop.f32.mrf.mxu0  ;;  %v3726_v58 = vpop.f32.mrf.mxu1 }
 0x178   :  { %5650 = vst [vmem:[#allocation12_spill] sm:$0xff] %v4347_v57 }
 0x179   :  { %v4349_v59 = vpop.f32.mrf.mxu0  ;;  %v4351_v15 = vpop.f32.mrf.mxu1 }
 0x17a   :  { %5651 = vst [vmem:[#allocation13_spill] sm:$0xff] %v4349_v59  ;;  %691 = vrot.lane.b32.xlu0 %v551_v34, %s3966_s0  ;;  %683 = vrot.lane.b32.xlu1 %v4293_v31, %s3966_s0 }
 0x17b   :  { %v4356_v60 = vpop.f32.mrf.mxu0  ;;  %v3729_v61 = vpop.f32.mrf.mxu1 }
 0x17c   :  { %5652 = vst [vmem:[#allocation14_spill] sm:$0xff] %v4356_v60 }
 0x17d   :  { %v4358_v62 = vpop.f32.mrf.mxu0  ;;  %v4360_v23 = vpop.f32.mrf.mxu1 }
 0x17e   :  { %5653 = vst [vmem:[#allocation15_spill] sm:$0xff] %v4358_v62  ;;  %896 = vrot.lane.b32.xlu0 %v551_v34, %s3967_s1  ;;  %888 = vrot.lane.b32.xlu1 %v4293_v31, %s3967_s1 }
 0x17f   :  { %v4365_v63 = vpop.f32.mrf.mxu0  ;;  %v3730_v4 = vpop.f32.mrf.mxu1 }
 0x180   :  { %5654 = vst [vmem:[#allocation16_spill] sm:$0xff] %v4365_v63 }
 0x181   :  { %v4367_v7 = vpop.f32.mrf.mxu0  ;;  %v4369_v12 = vpop.f32.mrf.mxu1 }
 0x182   :  { %5655 = vst [vmem:[#allocation17_spill] sm:$0xff] %v4367_v7  ;;  %892 = vrot.lane.b32.xlu0 %v4295_v33, %s3967_s1  ;;  %687 = vrot.lane.b32.xlu1 %v4295_v33, %s3966_s0 }
 0x183   :  { %v4375_v16 = vpop.f32.mrf.mxu0  ;;  %v3733_v18 = vpop.f32.mrf.mxu1 }
 0x184   :  { %5656 = vst [vmem:[#allocation18_spill] sm:$0xff] %v4375_v16 }
 0x185   :  { %v487_v20 = vpop.f32.mrf.mxu0  ;;  %v591_v22 = vpop.f32.mrf.mxu1 }
 0x186   :  { %689 = vrot.lane.b32.xlu1 %v4301_v35, %s3966_s0  ;;  %697 = vrot.lane.b32.xlu0 %v556_v38, %s3966_s0 }
 0x187   :  { %v488_v25 = vpop.f32.mrf.mxu0  ;;  %v3734_v27 = vpop.f32.mrf.mxu1 }
 0x18a   :  { %894 = vrot.lane.b32.xlu1 %v4301_v35, %s3967_s1  ;;  %902 = vrot.lane.b32.xlu0 %v556_v38, %s3967_s1 }
 0x18e   :  { %898 = vrot.lane.b32.xlu0 %v4303_v37, %s3967_s1  ;;  %693 = vrot.lane.b32.xlu1 %v4303_v37, %s3966_s0 }
 0x192   :  { %703 = vrot.lane.b32.xlu0 %v559_v41, %s3966_s0  ;;  %695 = vrot.lane.b32.xlu1 %v4308_v39, %s3966_s0 }
 0x196   :  { %908 = vrot.lane.b32.xlu0 %v559_v41, %s3967_s1  ;;  %900 = vrot.lane.b32.xlu1 %v4308_v39, %s3967_s1 }
 0x19a   :  { %904 = vrot.lane.b32.xlu0 %v4310_v0, %s3967_s1  ;;  %699 = vrot.lane.b32.xlu1 %v4310_v0, %s3966_s0 }
 0x19e   :  { %701 = vrot.lane.b32.xlu1 %v4315_v42, %s3966_s0  ;;  %709 = vrot.lane.b32.xlu0 %v564_v1, %s3966_s0 }
 0x1a2   :  { %906 = vrot.lane.b32.xlu1 %v4315_v42, %s3967_s1  ;;  %914 = vrot.lane.b32.xlu0 %v564_v1, %s3967_s1 }
 0x1a6   :  { %910 = vrot.lane.b32.xlu0 %v4317_v45, %s3967_s1  ;;  %705 = vrot.lane.b32.xlu1 %v4317_v45, %s3966_s0 }
 0x1aa   :  { %715 = vrot.lane.b32.xlu0 %v567_v49, %s3966_s0  ;;  %707 = vrot.lane.b32.xlu1 %v4323_v46, %s3966_s0 }
 0x1ae   :  { %920 = vrot.lane.b32.xlu0 %v567_v49, %s3967_s1  ;;  %912 = vrot.lane.b32.xlu1 %v4323_v46, %s3967_s1 }
 0x1b2   :  { %916 = vrot.lane.b32.xlu0 %v4325_v48, %s3967_s1  ;;  %711 = vrot.lane.b32.xlu1 %v4325_v48, %s3966_s0 }
 0x1b6   :  { %713 = vrot.lane.b32.xlu1 %v4330_v2, %s3966_s0  ;;  %721 = vrot.lane.b32.xlu0 %v572_v52, %s3966_s0 }
 0x1ba   :  { %918 = vrot.lane.b32.xlu1 %v4330_v2, %s3967_s1  ;;  %926 = vrot.lane.b32.xlu0 %v572_v52, %s3967_s1 }
 0x1bc   :  { %v4423_v29 = vpop.permute.xlu1 %657  ;;  %v4425_v32 = vpop.permute.xlu0 %661 }
 0x1be   :  { %922 = vrot.lane.b32.xlu0 %v4332_v51, %s3967_s1  ;;  %717 = vrot.lane.b32.xlu1 %v4332_v51, %s3966_s0 }
 0x1c0   :  { %v4431_v34 = vpop.permute.xlu1 %659  ;;  %v4433_v36 = vpop.permute.xlu0 %667 }
 0x1c2   :  { %727 = vrot.lane.b32.xlu0 %v4341_v55, %s3966_s0  ;;  %719 = vrot.lane.b32.xlu1 %v4337_v53, %s3966_s0 }
 0x1c4   :  { %v4439_v38 = vpop.permute.xlu1 %663  ;;  %v4441_v40 = vpop.permute.xlu0 %872 }
 0x1c6   :  { %932 = vrot.lane.b32.xlu0 %v4341_v55, %s3967_s1  ;;  %924 = vrot.lane.b32.xlu1 %v4337_v53, %s3967_s1 }
 0x1c8   :  { %v4447_v41 = vpop.permute.xlu1 %665  ;;  %v4449_v44 = vpop.permute.xlu0 %673 }
 0x1ca   :  { %928 = vrot.lane.b32.xlu0 %v4339_v54, %s3967_s1  ;;  %723 = vrot.lane.b32.xlu1 %v4339_v54, %s3966_s0 }
 0x1cc   :  { %v4455_v1 = vpop.permute.xlu1 %870  ;;  %v4457_v47 = vpop.permute.xlu0 %878 }
 0x1ce   :  { %725 = vrot.lane.b32.xlu1 %v4347_v57, %s3966_s0  ;;  %729 = vrot.lane.b32.xlu0 %v4349_v59, %s3966_s0 }
 0x1d0   :  { %v4463_v49 = vpop.permute.xlu1 %669  ;;  %v4465_v50 = vpop.permute.xlu0 %874 }
 0x1d2   :  { %930 = vrot.lane.b32.xlu1 %v4347_v57, %s3967_s1  ;;  %938 = vrot.lane.b32.xlu0 %v4351_v15, %s3967_s1 }
 0x1d4   :  { %v4471_v52 = vpop.permute.xlu1 %671  ;;  %v4473_v13 = vpop.permute.xlu0 %679 }
 0x1d6   :  { %733 = vrot.lane.b32.xlu1 %v4351_v15, %s3966_s0  ;;  %934 = vrot.lane.b32.xlu0 %v4349_v59, %s3967_s1 }
 0x1d8   :  { %v4479_v55 = vpop.permute.xlu1 %876  ;;  %v4481_v58 = vpop.permute.xlu0 %884 }
 0x1da   :  { %936 = vrot.lane.b32.xlu1 %v4356_v60, %s3967_s1  ;;  %731 = vrot.lane.b32.xlu0 %v4356_v60, %s3966_s0 }
 0x1dc   :  { %v4487_v61 = vpop.permute.xlu1 %675  ;;  %v4489_v4 = vpop.permute.xlu0 %880 }
 0x1de   :  { %739 = vrot.lane.b32.xlu1 %v4360_v23, %s3966_s0  ;;  %735 = vrot.lane.b32.xlu0 %v4358_v62, %s3966_s0 }
 0x1e0   :  { %v4495_v15 = vpop.permute.xlu1 %677  ;;  %v4497_v18 = vpop.permute.xlu0 %685 }
 0x1e1   :  { %5657 = vst [vmem:[#allocation19_spill] sm:$0xff] %v4497_v18 }
 0x1e2   :  { %944 = vrot.lane.b32.xlu1 %v4360_v23, %s3967_s1  ;;  %737 = vrot.lane.b32.xlu0 %v4365_v63, %s3966_s0 }
 0x1e4   :  { %v4503_v20 = vpop.permute.xlu1 %882  ;;  %v4505_v22 = vpop.permute.xlu0 %890 }
 0x1e5   :  { %5658 = vst [vmem:[#allocation20_spill] sm:$0xff] %v4505_v22 }
 0x1e6   :  { %940 = vrot.lane.b32.xlu1 %v4358_v62, %s3967_s1  ;;  %942 = vrot.lane.b32.xlu0 %v4365_v63, %s3967_s1 }
 0x1e8   :  { %v4511_v25 = vpop.permute.xlu1 %681  ;;  %v4513_v27 = vpop.permute.xlu0 %886 }
 0x1e9   :  { %5659 = vst [vmem:[#allocation21_spill] sm:$0xff] %v4511_v25  ;;  %5660 = vst [vmem:[#allocation22_spill] sm:$0xff] %v4513_v27 }
 0x1ea   :  { %745 = vrot.lane.b32.xlu1 %v4369_v12, %s3966_s0  ;;  %946 = vrot.lane.b32.xlu0 %v4367_v7, %s3967_s1 }
 0x1ec   :  { %v4519_v23 = vpop.permute.xlu1 %683  ;;  %v692_v43 = vpop.permute.xlu0 %691 }
 0x1ed   :  { %5661 = vst [vmem:[#allocation23_spill] sm:$0xff] %v4519_v23 }
 0x1ee   :  { %741 = vrot.lane.b32.xlu1 %v4367_v7, %s3966_s0  ;;  %743 = vrot.lane.b32.xlu0 %v4375_v16, %s3966_s0 }
 0x1f0   :  { %v4525_v22 = vpop.permute.xlu1 %888  ;;  %v897_v31 = vpop.permute.xlu0 %896 }
 0x1f1   :  { %5662 = vst [vmem:[#allocation24_spill] sm:$0xff] %v4525_v22 }
 0x1f2   :  { %950 = vrot.lane.b32.xlu1 %v4369_v12, %s3967_s1  ;;  %948 = vrot.lane.b32.xlu0 %v4375_v16, %s3967_s1 }
 0x1f4   :  { %v688_v27 = vpop.permute.xlu1 %687  ;;  %v893_v28 = vpop.permute.xlu0 %892 }
 0x1f6   :  { %653 = vrot.lane.b32.xlu1 %v4255_v8, %s3966_s0  ;;  %868 = vrot.lane.b32.xlu0 %v4267_v14, %s3967_s1 }
 0x1f8   :  { %v690_v7 = vpop.permute.xlu1 %689  ;;  %v698_v62 = vpop.permute.xlu0 %697 }
 0x1f9   :  { %v762_v25 = vsel %vm747_vm7, %v688_v27, %v690_v7  ;;  %v763_v23 = vsel %vm747_vm7, %v690_v7, %v692_v43 }
 0x1fa   :  { %864 = vrot.lane.b32.xlu1 %v4265_v11, %s3967_s1  ;;  %655 = vrot.lane.b32.xlu0 %v4253_v6, %s3966_s0  ;;  %v830_v57 = vmax.f32 %v4295_v33, %v762_v25  ;;  %v831_v54 = vmax.f32 %v4301_v35, %v763_v23 }
 0x1fc   :  { %v895_v12 = vpop.permute.xlu1 %894  ;;  %v903_v22 = vpop.permute.xlu0 %902 }
 0x1fd   :  { %v967_v63 = vsel %vm952_vm8, %v893_v28, %v895_v12  ;;  %v968_v60 = vsel %vm952_vm8, %v895_v12, %v897_v31 }
 0x1fe   :  { %651 = vrot.lane.b32.xlu1 %v4251_v5, %s3966_s0  ;;  %866 = vrot.lane.b32.xlu0 %v4259_v10, %s3967_s1  ;;  %v4559_v7 = vmax.f32 %v830_v57, %v967_v63  ;;  %v4561_v28 = vmax.f32 %v831_v54, %v968_v60 }
 0x200   :  { %v694_v16 = vpop.permute.xlu1 %693  ;;  %v899_v18 = vpop.permute.xlu0 %898  ;;  %5663 = vst [vmem:[#allocation25_spill] sm:$0xff] %v4559_v7  ;;  %5664 = vst [vmem:[#allocation26_spill] sm:$0xff] %v4561_v28  ;;  %v5631_v54 = vrot.slane %v4559_v7, 1 }
 0x202   :  { %647 = vrot.lane.b32.xlu1 %v4249_v56, %s3966_s0  ;;  %862 = vrot.lane.b32.xlu0 %v4257_v9, %s3967_s1 }
 0x204   :  { %v696_v59 = vpop.permute.xlu1 %695  ;;  %v704_v10 = vpop.permute.xlu0 %703 }
 0x205   :  { %v764_v27 = vsel %vm747_vm7, %v694_v16, %v696_v59  ;;  %v765_v43 = vsel %vm747_vm7, %v696_v59, %v698_v62 }
 0x206   :  { %858 = vrot.lane.b32.xlu1 %v4255_v8, %s3967_s1  ;;  %649 = vrot.lane.b32.xlu0 %v4247_v3, %s3966_s0  ;;  %v832_v31 = vmax.f32 %v4303_v37, %v764_v27  ;;  %v833_v33 = vmax.f32 %v4308_v39, %v765_v43  ;;  %v5626_v37 = vrot.slane %v4561_v28, 1  ;;  %v5629_v39 = vrot.slane %v4561_v28, 2 }
 0x207   :  { %v5630_v27 = vrot.slane %v4559_v7, 2 }
 0x208   :  { %v901_v25 = vpop.permute.xlu1 %900  ;;  %v909_v35 = vpop.permute.xlu0 %908 }
 0x209   :  { %v969_v16 = vsel %vm952_vm8, %v899_v18, %v901_v25  ;;  %v970_v59 = vsel %vm952_vm8, %v901_v25, %v903_v22 }
 0x20a   :  { %v1037_v62 = vmax.f32 %v832_v31, %v969_v16  ;;  %v1038_v23 = vmax.f32 %v833_v33, %v970_v59  ;;  %645 = vrot.lane.b32.xlu1 %v4245_v30, %s3966_s0  ;;  %860 = vrot.lane.b32.xlu0 %v4253_v6, %s3967_s1 }
 0x20c   :  { %v1120_v57 = vrot.slane %v1037_v62, 1  ;;  %v1122_v60 = vrot.slane %v1038_v23, 1  ;;  %v1254_v63 = vrot.slane %v1037_v62, 2  ;;  %v1256_v18 = vrot.slane %v1038_v23, 2  ;;  %v700_v12 = vpop.permute.xlu1 %699  ;;  %v905_v22 = vpop.permute.xlu0 %904 }
 0x20e   :  { %852 = vrot.lane.b32.xlu1 %v4249_v56, %s3967_s1  ;;  %856 = vrot.lane.b32.xlu0 %v4251_v5, %s3967_s1  ;;  %v1123_v6 = vsel %vm188_vm1, %v5626_v37, %v1122_v60  ;;  %v1257_v43 = vsel %vm359_vm2, %v5629_v39, %v1256_v18  ;;  %v1121_v31 = vsel %vm188_vm1, %v5631_v54, %v1120_v57 }
 0x20f   :  { %v1205_v33 = vmax.f32 %v4561_v28, %v1123_v6  ;;  %v1204_v25 = vmax.f32 %v4559_v7, %v1121_v31  ;;  %v1255_v16 = vsel %vm359_vm2, %v5630_v27, %v1254_v63  ;;  %v1359_v6 = vld [vmem:[%s5603_s2 + $0x8] sm:$0xff] }
 0x210   :  { %v702_v59 = vpop.permute.xlu1 %701  ;;  %v710_v56 = vpop.permute.xlu0 %709  ;;  %3366 = vmatprep.mubr.msk.f32.mxu0 %vm1376_vm9, %v1359_v6 }
 0x211   :  { %v766_v37 = vsel %vm747_vm7, %v700_v12, %v702_v59  ;;  %v767_v5 = vsel %vm747_vm7, %v702_v59, %v704_v10  ;;  %v4595_v8 = vmax.f32 %v1205_v33, %v1257_v43  ;;  %v4597_v39 = vmax.f32 %v1204_v25, %v1255_v16 }
 0x212   :  { %850 = vrot.lane.b32.xlu1 %v4245_v30, %s3967_s1  ;;  %854 = vrot.lane.b32.xlu0 %v4247_v3, %s3967_s1  ;;  %v834_v12 = vmax.f32 %v4310_v0, %v766_v37  ;;  %v835_v10 = vmax.f32 %v4315_v42, %v767_v5 }
 0x213   :  { %5665 = vst [vmem:[#allocation27_spill] sm:$0xff] %v4595_v8  ;;  %5666 = vst [vmem:[#allocation28_spill] sm:$0xff] %v4597_v39 }
 0x214   :  { %v907_v43 = vpop.permute.xlu1 %906  ;;  %v915_v31 = vpop.permute.xlu0 %914 }
 0x215   :  { %v971_v33 = vsel %vm952_vm8, %v905_v22, %v907_v43  ;;  %v972_v25 = vsel %vm952_vm8, %v907_v43, %v909_v35 }
 0x216   :  { %v1039_v16 = vmax.f32 %v834_v12, %v971_v33  ;;  %v1040_v59 = vmax.f32 %v835_v10, %v972_v25 }
 0x218   :  { %v1124_v3 = vrot.slane %v1039_v16, 1  ;;  %v1126_v27 = vrot.slane %v1040_v59, 1  ;;  %v1258_v54 = vrot.slane %v1039_v16, 2  ;;  %v1260_v30 = vrot.slane %v1040_v59, 2  ;;  %v706_v39 = vpop.permute.xlu1 %705  ;;  %v911_v8 = vpop.permute.xlu0 %910 }
 0x21a   :  { %v1127_v6 = vsel %vm188_vm1, %v1122_v60, %v1126_v27  ;;  %v1261_v0 = vsel %vm359_vm2, %v1256_v18, %v1260_v30  ;;  %v1125_v5 = vsel %vm188_vm1, %v1120_v57, %v1124_v3  ;;  %v1259_v42 = vsel %vm359_vm2, %v1254_v63, %v1258_v54 }
 0x21b   :  { %v1207_v37 = vmax.f32 %v1038_v23, %v1127_v6  ;;  %v1206_v22 = vmax.f32 %v1037_v62, %v1125_v5 }
 0x21c   :  { %v708_v7 = vpop.permute.xlu1 %707  ;;  %v716_v35 = vpop.permute.xlu0 %715 }
 0x21d   :  { %v768_v12 = vsel %vm747_vm7, %v706_v39, %v708_v7  ;;  %v769_v10 = vsel %vm747_vm7, %v708_v7, %v710_v56  ;;  %v4617_v43 = vmax.f32 %v1207_v37, %v1261_v0  ;;  %v4619_v33 = vmax.f32 %v1206_v22, %v1259_v42 }
 0x21e   :  { %v836_v60 = vmax.f32 %v4317_v45, %v768_v12  ;;  %v837_v18 = vmax.f32 %v4323_v46, %v769_v10 }
 0x220   :  { %v913_v25 = vpop.permute.xlu1 %912  ;;  %v921_v57 = vpop.permute.xlu0 %920 }
 0x221   :  { %v973_v63 = vsel %vm952_vm8, %v911_v8, %v913_v25  ;;  %v974_v62 = vsel %vm952_vm8, %v913_v25, %v915_v31 }
 0x222   :  { %v1041_v23 = vmax.f32 %v836_v60, %v973_v63  ;;  %v1042_v6 = vmax.f32 %v837_v18, %v974_v62 }
 0x224   :  { %v1128_v5 = vrot.slane %v1041_v23, 1  ;;  %v1130_v39 = vrot.slane %v1042_v6, 1  ;;  %v1262_v28 = vrot.slane %v1041_v23, 2  ;;  %v1264_v56 = vrot.slane %v1042_v6, 2  ;;  %v712_v7 = vpop.permute.xlu1 %711  ;;  %v917_v0 = vpop.permute.xlu0 %916 }
 0x226   :  { %v1131_v42 = vsel %vm188_vm1, %v1126_v27, %v1130_v39  ;;  %v1265_v45 = vsel %vm359_vm2, %v1260_v30, %v1264_v56  ;;  %v1129_v46 = vsel %vm188_vm1, %v1124_v3, %v1128_v5  ;;  %v1263_v37 = vsel %vm359_vm2, %v1258_v54, %v1262_v28 }
 0x227   :  { %v1209_v22 = vmax.f32 %v1040_v59, %v1131_v42  ;;  %v1208_v8 = vmax.f32 %v1039_v16, %v1129_v46 }
 0x228   :  { %v714_v12 = vpop.permute.xlu1 %713  ;;  %v722_v31 = vpop.permute.xlu0 %721 }
 0x229   :  { %v770_v10 = vsel %vm747_vm7, %v712_v7, %v714_v12  ;;  %v771_v60 = vsel %vm747_vm7, %v714_v12, %v716_v35  ;;  %v4631_v18 = vmax.f32 %v1209_v22, %v1265_v45  ;;  %v4633_v25 = vmax.f32 %v1208_v8, %v1263_v37  ;;  %v3861_v12 = vld [vmem:[%s5604_s3 + $0x78] sm:$0xff]  }
 0x22a   :  { %v838_v27 = vmax.f32 %v4325_v48, %v770_v10  ;;  %v839_v30 = vmax.f32 %v4330_v2, %v771_v60  ;;  %3503 = vmatprep.subr.bf16.mxu1 %v3861_v12  ;;  %v3864_v60 = vld [vmem:[%s5604_s3 + $0x30] sm:$0xff]   ;;  %v3870_v12 = vld [vmem:[%s5604_s3 + $0x20] sm:$0xff]  }
 0x22c   :  { %v919_v63 = vpop.permute.xlu1 %918  ;;  %v927_v3 = vpop.permute.xlu0 %926 }
 0x22d   :  { %v975_v54 = vsel %vm952_vm8, %v917_v0, %v919_v63  ;;  %v976_v16 = vsel %vm952_vm8, %v919_v63, %v921_v57 }
 0x22e   :  { %v4639_v59 = vmax.f32 %v838_v27, %v975_v54  ;;  %v1044_v62 = vmax.f32 %v839_v30, %v976_v16  ;;  %v3865_v27 = vld [vmem:[%s5604_s3 + $0x68] sm:$0xff]  }
 0x230   :  { %v1132_v7 = vrot.slane %v4639_v59, 1  ;;  %v1134_v35 = vrot.slane %v1044_v62, 1  ;;  %v5637_v42 = vrot.slane %v4639_v59, 2  ;;  %v1268_v45 = vrot.slane %v1044_v62, 2  ;;  %v4643_v46 = vpop.permute.xlu1 %717  ;;  %v4645_v48 = vpop.permute.xlu0 %922 }
 0x232   :  { %v1135_v2 = vsel %vm188_vm1, %v1130_v39, %v1134_v35  ;;  %v1269_v37 = vsel %vm359_vm2, %v1264_v56, %v1268_v45  ;;  %v1133_v57 = vsel %vm188_vm1, %v1128_v5, %v1132_v7  ;;  %v1267_v0 = vsel %vm359_vm2, %v1262_v28, %v5637_v42  ;;  %v3862_v39 = vld [vmem:[%s5604_s3 + $0x38] sm:$0xff]   ;;  %v3863_v56 = vld [vmem:[%s5604_s3 + $0x70] sm:$0xff]  }
 0x233   :  { %v1211_v22 = vmax.f32 %v1042_v6, %v1135_v2  ;;  %v1210_v8 = vmax.f32 %v1041_v23, %v1133_v57  ;;  %3504 = vmatpush3.bf16.msra.mxu1 %v3862_v39  ;;  %v3866_v2 = vld [vmem:[%s5604_s3 + $0x28] sm:$0xff]  }
 0x234   :  { %v4664_v10 = vpop.permute.xlu1 %719  ;;  %v4666_v5 = vpop.permute.xlu0 %727  ;;  %3505 = vmatprep.subr.bf16.mxu1 %v3863_v56  ;;  %v3872_v56 = vld [vmem:[%s5604_s3 + $0x58] sm:$0xff]  }
 0x235   :  { %v773_v28 = vsel %vm747_vm7, %v4664_v10, %v722_v31  ;;  %v4670_v23 = vmax.f32 %v1211_v22, %v1269_v37  ;;  %v4672_v6 = vmax.f32 %v1210_v8, %v1267_v0  ;;  %v3868_v37 = vld [vmem:[%s5604_s3 + $0x60] sm:$0xff]  }
 0x236   :  { %v841_v30 = vmax.f32 %v4337_v53, %v773_v28 }
 0x237   :  { %3506 = vmatpush3.bf16.msra.mxu1 %v3864_v60 }
 0x238   :  { %v4681_v63 = vpop.permute.xlu1 %924  ;;  %v4683_v31 = vpop.permute.xlu0 %932  ;;  %3507 = vmatprep.subr.bf16.mxu1 %v3865_v27 }
 0x239   :  { %v978_v54 = vsel %vm952_vm8, %v4681_v63, %v927_v3 }
 0x23a   :  { %v4687_v16 = vmax.f32 %v841_v30, %v978_v54  ;;  %v3878_v54 = vld [vmem:[%s5604_s3 + $0x10] sm:$0xff]  }
 0x23b   :  { %3508 = vmatpush3.bf16.msra.mxu1 %v3866_v2 }
 0x23c   :  { %v5639_v53 = vrot.slane %v4687_v16, 1  ;;  %v5638_v57 = vrot.slane %v4687_v16, 2  ;;  %v4697_v0 = vpop.permute.xlu1 %723  ;;  %v4699_v22 = vpop.permute.xlu0 %928  ;;  %3509 = vmatprep.subr.bf16.mxu1 %v3868_v37 }
 0x23e   :  { %v1139_v3 = vsel %vm188_vm1, %v1134_v35, %v5639_v53  ;;  %v1273_v8 = vsel %vm359_vm2, %v1268_v45, %v5638_v57  ;;  %v3874_v35 = vld [vmem:[%s5604_s3 + $0x18] sm:$0xff]   ;;  %v3876_v45 = vld [vmem:[%s5604_s3 + $0x50] sm:$0xff]  }
 0x23f   :  { %v1213_v39 = vmax.f32 %v1044_v62, %v1139_v3  ;;  %3510 = vmatpush3.bf16.msra.mxu1 %v3870_v12  ;;  %v757_v12 = vsel %vm747_vm7, %v4471_v52, %v4449_v44  ;;  %v960_v44 = vsel %vm952_vm8, %v4455_v1, %v4441_v40 }
 0x240   :  { %v726_v28 = vpop.permute.xlu1 %725  ;;  %v730_v60 = vpop.permute.xlu0 %729  ;;  %3511 = vmatprep.subr.bf16.mxu1 %v3872_v56  ;;  %v962_v56 = vsel %vm952_vm8, %v4479_v55, %v4457_v47  ;;  %v758_v47 = vsel %vm747_vm7, %v4487_v61, %v4495_v15 }
 0x241   :  { %v4713_v27 = vmax.f32 %v1213_v39, %v1273_v8  ;;  %v755_v39 = vsel %vm747_vm7, %v4447_v41, %v4433_v36  ;;  %v961_v36 = vsel %vm952_vm8, %v4465_v50, %v4479_v55  ;;  %v963_v50 = vsel %vm952_vm8, %v4489_v4, %v4503_v20 }
 0x242   :  { %v823_v57 = vmax.f32 %v4272_v17, %v755_v39  ;;  %v4766_v17 = vsel %vm747_vm7, %v4431_v34, %v4425_v32  ;;  %v759_v32 = vsel %vm747_vm7, %v4495_v15, %v4473_v13 }
 0x243   :  { %3512 = vmatpush3.bf16.msra.mxu1 %v3874_v35  ;;  %v756_v35 = vsel %vm747_vm7, %v4463_v49, %v4471_v52  ;;  %v4761_v49 = vsel %vm747_vm7, %v4423_v29, %v4431_v34  ;;  %v826_v34 = vmax.f32 %v4281_v24, %v758_v47  ;;  %v827_v15 = vmax.f32 %v4286_v26, %v759_v32 }
 0x244   :  { %v4721_v62 = vpop.permute.xlu1 %930  ;;  %v4723_v30 = vpop.permute.xlu0 %938  ;;  %3513 = vmatprep.subr.bf16.mxu1 %v3876_v45  ;;  %v825_v45 = vmax.f32 %v4279_v21, %v757_v12  ;;  %v824_v21 = vmax.f32 %v4274_v19, %v756_v35  ;;  %v4768_v40 = vmax.f32 %v823_v57, %v960_v44  ;;  %v4776_v19 = vsel %vm747_vm7, %v4439_v38, %v4447_v41 }
 0x245   :  { %v964_v38 = vsel %vm952_vm8, %v4503_v20, %v4481_v58  ;;  %v4792_v41 = vmax.f32 %v826_v34, %v963_v50  ;;  %v822_v12 = vmax.f32 %v4267_v14, %v4776_v19  ;;  %v772_v58 = vsel %vm747_vm7, %v4643_v46, %v4664_v10 }
 0x246   :  { %v4752_v53 = vmax.f32 %v825_v45, %v962_v56  ;;  %v4778_v29 = vmax.f32 %v824_v21, %v961_v36  ;;  %v5640_v13 = vrot.slane %v4768_v40, 1  ;;  %v774_v20 = vsel %vm747_vm7, %v4697_v0, %v726_v28 }
 0x247   :  { %3514 = vmatpush3.bf16.msra.mxu1 %v3878_v54  ;;  %v4807_v36 = vmax.f32 %v827_v15, %v964_v38  ;;  %v775_v26 = vsel %vm747_vm7, %v726_v28, %v4666_v5  ;;  %v1108_v21 = vrot.slane %v4792_v41, 1  ;;  %v840_v50 = vmax.f32 %v4332_v51, %v772_v58  ;;  %v5667_v28 = vld [vmem:[#allocation11_spill] sm:$0xff]  ;;  %v5671_v58 = vld [vmem:[#allocation16_spill] sm:$0xff] }
 0x248   :  { %v734_v2 = vpop.permute.xlu1 %733  ;;  %v4728_v37 = vpop.permute.xlu0 %934  ;;  %v1106_v61 = vrot.slane %v4752_v53, 1  ;;  %v977_v5 = vsel %vm952_vm8, %v4645_v48, %v4681_v63  ;;  %v842_v32 = vmax.f32 %v5667_v28, %v774_v20  ;;  %v980_v51 = vsel %vm952_vm8, %v4721_v62, %v4683_v31  ;;  %v5670_v63 = vld [vmem:[#allocation14_spill] sm:$0xff]  ;;  %v5672_v20 = vld [vmem:[#allocation23_spill] sm:$0xff] }
 0x249   :  { %v5674_v28 = vld [vmem:[#allocation19_spill] sm:$0xff]  ;;  %v4846_v4 = vmax.f32 %v840_v50, %v977_v5  ;;  %v5686_v14 = vrot.slane %v4639_v59, 2 }
 0x24a   :  { %v4816_v47 = vsel %vm188_vm1, %v5640_v13, %v1106_v61  ;;  %v5668_v13 = vld [vmem:[#allocation12_spill] sm:$0xff]  ;;  %v5675_v31 = vld [vmem:[#allocation15_spill] sm:$0xff] }
 0x24b   :  { %v843_v45 = vmax.f32 %v5668_v13, %v775_v26  ;;  %v5673_v13 = vld [vmem:[#allocation21_spill] sm:$0xff] }
 0x24c   :  { %v4730_v3 = vpop.permute.xlu1 %936  ;;  %v732_v8 = vpop.permute.xlu0 %731  ;;  %v760_v26 = vsel %vm747_vm7, %v5673_v13, %v5672_v20 }
 0x24d   :  { %v776_v46 = vsel %vm747_vm7, %v730_v60, %v732_v8  ;;  %v777_v10 = vsel %vm747_vm7, %v732_v8, %v734_v2  ;;  %v979_v60 = vsel %vm952_vm8, %v4699_v22, %v4721_v62  ;;  %v5669_v8 = vld [vmem:[#allocation13_spill] sm:$0xff]  ;;  %v761_v22 = vsel %vm747_vm7, %v5672_v20, %v5674_v28 }
 0x24e   :  { %v844_v48 = vmax.f32 %v5669_v8, %v776_v46  ;;  %v4851_v46 = vmax.f32 %v843_v45, %v980_v51  ;;  %v982_v8 = vsel %vm952_vm8, %v4730_v3, %v4723_v30  ;;  %v5641_v45 = vrot.slane %v4807_v36, 1 }
 0x250   :  { %v740_v54 = vpop.permute.xlu1 %739  ;;  %v736_v42 = vpop.permute.xlu0 %735 }
 0x254   :  { %v945_v52 = vpop.permute.xlu1 %944  ;;  %v738_v55 = vpop.permute.xlu0 %737 }
 0x255   :  { %v779_v0 = vsel %vm747_vm7, %v738_v55, %v740_v54  ;;  %v778_v34 = vsel %vm747_vm7, %v736_v42, %v738_v55  ;;  %v845_v54 = vmax.f32 %v5670_v63, %v777_v10 }
 0x256   :  { %v847_v42 = vmax.f32 %v5671_v58, %v779_v0  ;;  %v846_v62 = vmax.f32 %v5675_v31, %v778_v34  ;;  %v5676_v34 = vld [vmem:[#allocation9_spill] sm:$0xff]  ;;  %v5678_v58 = vld [vmem:[#allocation24_spill] sm:$0xff] }
 0x258   :  { %v941_v39 = vpop.permute.xlu1 %940  ;;  %v943_v56 = vpop.permute.xlu0 %942 }
 0x259   :  { %v984_v2 = vsel %vm952_vm8, %v943_v56, %v945_v52  ;;  %v983_v55 = vsel %vm952_vm8, %v941_v39, %v943_v56  ;;  %v4849_v52 = vmax.f32 %v842_v32, %v979_v60  ;;  %v981_v39 = vsel %vm952_vm8, %v4728_v37, %v4730_v3  ;;  %v5680_v3 = vld [vmem:[#allocation20_spill] sm:$0xff] }
 0x25a   :  { %v4856_v56 = vmax.f32 %v847_v42, %v984_v2  ;;  %v4861_v50 = vmax.f32 %v846_v62, %v983_v55  ;;  %v828_v60 = vmax.f32 %v5676_v34, %v760_v26  ;;  %v4867_v51 = vmax.f32 %v844_v48, %v981_v39  ;;  %v5677_v2 = vld [vmem:[#allocation10_spill] sm:$0xff]  ;;  %v5681_v48 = vld [vmem:[#allocation17_spill] sm:$0xff] }
 0x25b   :  { %v4869_v37 = vmax.f32 %v845_v54, %v982_v8  ;;  %v829_v63 = vmax.f32 %v5677_v2, %v761_v22  ;;  %v5679_v42 = vld [vmem:[#allocation22_spill] sm:$0xff]  ;;  %v966_v55 = vsel %vm952_vm8, %v5678_v58, %v5680_v3  ;;  %v1140_v20 = vrot.slane %v4849_v52, 1 }
 0x25c   :  { %v746_v38 = vpop.permute.xlu1 %745  ;;  %v947_v15 = vpop.permute.xlu0 %946  ;;  %v965_v30 = vsel %vm952_vm8, %v5679_v42, %v5678_v58  ;;  %v1150_v13 = vrot.slane %v4856_v56, 1  ;;  %v5682_v54 = vld [vmem:[#allocation18_spill] sm:$0xff]  ;;  %v1142_v62 = vrot.slane %v4851_v46, 1  ;;  %v1148_v39 = vrot.slane %v4861_v50, 1 }
 0x25d   :  { %v1144_v8 = vrot.slane %v4867_v51, 1  ;;  %v1146_v34 = vrot.slane %v4869_v37, 1  ;;  %v1282_v24 = vrot.slane %v4861_v50, 2 }
 0x260   :  { %v742_v10 = vpop.permute.xlu1 %741  ;;  %v744_v0 = vpop.permute.xlu0 %743 }
 0x261   :  { %v780_v5 = vsel %vm747_vm7, %v742_v10, %v744_v0  ;;  %v781_v32 = vsel %vm747_vm7, %v744_v0, %v746_v38  ;;  %v1136_v38 = vrot.slane %v4846_v4, 1 }
 0x262   :  { %v848_v26 = vmax.f32 %v5681_v48, %v780_v5  ;;  %v849_v28 = vmax.f32 %v5682_v54, %v781_v32  ;;  %v4893_v5 = vmax.f32 %v828_v60, %v965_v30  ;;  %v4895_v32 = vmax.f32 %v829_v63, %v966_v55 }
 0x263   :  { %v4900_v42 = vsel %vm188_vm1, %v1132_v7, %v1136_v38  ;;  %v1151_v55 = vsel %vm188_vm1, %v1146_v34, %v1150_v13  ;;  %v5683_v54 = vrot.slane %v4687_v16, 1 }
 0x264   :  { %v951_v31 = vpop.permute.xlu1 %950  ;;  %v949_v22 = vpop.permute.xlu0 %948 }
 0x265   :  { %v985_v10 = vsel %vm952_vm8, %v947_v15, %v949_v22  ;;  %v986_v0 = vsel %vm952_vm8, %v949_v22, %v951_v31  ;;  %v4907_v15 = vsel %vm188_vm1, %v1106_v61, %v5641_v45  ;;  %v1143_v61 = vsel %vm188_vm1, %v5683_v54, %v1142_v62 }
 0x266   :  { %v4889_v2 = vmax.f32 %v848_v26, %v985_v10  ;;  %v4891_v58 = vmax.f32 %v849_v28, %v986_v0  ;;  %v1149_v26 = vsel %vm188_vm1, %v1144_v8, %v1148_v39  ;;  %v1141_v28 = vsel %vm188_vm1, %v1136_v38, %v1140_v20 }
 0x267   :  { %v1284_v31 = vrot.slane %v4856_v56, 2  ;;  %v1147_v10 = vsel %vm188_vm1, %v1142_v62, %v1146_v34  ;;  %v1145_v0 = vsel %vm188_vm1, %v1140_v20, %v1144_v8  ;;  %v1219_v38 = vmax.f32 %v4869_v37, %v1151_v55 }
 0x268   :  { %v1152_v3 = vrot.slane %v4889_v2, 1  ;;  %v1154_v48 = vrot.slane %v4891_v58, 1  ;;  %v5642_v60 = vrot.slane %v4891_v58, 2  ;;  %v4912_v63 = vpop.permute.xlu1 %653  ;;  %v869_v30 = vpop.permute.xlu0 %868  ;;  %v1286_v7 = vrot.slane %v4889_v2, 2 }
 0x269   :  { %v1280_v45 = vrot.slane %v4869_v37, 2  ;;  %v1218_v62 = vmax.f32 %v4867_v51, %v1149_v26  ;;  %v1217_v37 = vmax.f32 %v4851_v46, %v1147_v10  ;;  %v1276_v34 = vrot.slane %v4851_v46, 2 }
 0x26a   :  { %v1155_v22 = vsel %vm188_vm1, %v1150_v13, %v1154_v48  ;;  %v1153_v54 = vsel %vm188_vm1, %v1148_v39, %v1152_v3  ;;  %v1289_v13 = vsel %vm359_vm2, %v1284_v31, %v5642_v60  ;;  %v1287_v39 = vsel %vm359_vm2, %v1282_v24, %v1286_v7 }
 0x26b   :  { %v1221_v44 = vmax.f32 %v4856_v56, %v1155_v22  ;;  %v1220_v20 = vmax.f32 %v4861_v50, %v1153_v54  ;;  %v1278_v56 = vrot.slane %v4867_v51, 2  ;;  %v1285_v22 = vsel %vm359_vm2, %v1280_v45, %v1284_v31 }
 0x26c   :  { %v865_v57 = vpop.permute.xlu1 %864  ;;  %v4934_v35 = vpop.permute.xlu0 %655  ;;  %v1216_v60 = vmax.f32 %v4849_v52, %v1145_v0  ;;  %v1274_v50 = vrot.slane %v4849_v52, 2  ;;  %v1353_v26 = vmax.f32 %v1219_v38, %v1285_v22  ;;  %v1112_v54 = vrot.slane %v4893_v5, 1 }
 0x26d   :  { %v1355_v8 = vmax.f32 %v1221_v44, %v1289_v13  ;;  %v1354_v55 = vmax.f32 %v1220_v20, %v1287_v39  ;;  %v1283_v51 = vsel %vm359_vm2, %v1278_v56, %v1282_v24  ;;  %v1215_v44 = vmax.f32 %v4687_v16, %v1143_v61 }
 0x26e   :  { %v1352_v46 = vmax.f32 %v1218_v62, %v1283_v51  ;;  %v1281_v20 = vsel %vm359_vm2, %v1276_v34, %v1280_v45  ;;  %v1214_v31 = vmax.f32 %v4846_v4, %v1141_v28  ;;  %v1270_v0 = vrot.slane %v4846_v4, 2 }
 0x26f   :  { %1410 = vmatprep.subr.mxu0 %v1355_v8  ;;  %v959_v52 = vsel %vm952_vm8, %v869_v30, %v4455_v1  ;;  %v1351_v24 = vmax.f32 %v1217_v37, %v1281_v20  ;;  %v1279_v61 = vsel %vm359_vm2, %v1274_v50, %v1278_v56  ;;  %v1114_v38 = vrot.slane %v4895_v32, 1 }
 0x270   :  { %v4953_v13 = vpop.permute.xlu1 %651  ;;  %1411 = vmatpush1.msra.mxu0 %v1354_v55  ;;  %v867_v10 = vpop.permute.xlu0 %866  ;;  %v1350_v8 = vmax.f32 %v1216_v60, %v1279_v61  ;;  %v5684_v39 = vrot.slane %v4687_v16, 2  ;;  %v1212_v45 = vmax.f32 %v4639_v59, %v4900_v42  ;;  %v1275_v1 = vsel %vm359_vm2, %v1270_v0, %v1274_v50  ;;  %v5692_v61 = vld [vmem:[#allocation26_spill] sm:$0xff] }
 0x271   :  { %1412 = vmatprep.subr.mxu0 %v1353_v26  ;;  %v958_v4 = vsel %vm952_vm8, %v865_v57, %v867_v10  ;;  %v1197_v30 = vmax.f32 %v4768_v40, %v4816_v47  ;;  %v1244_v56 = vrot.slane %v4807_v36, 2  ;;  %v4975_v16 = vmax.f32 %v822_v12, %v959_v52 }
 0x272   :  { %1413 = vmatpush1.msra.mxu0 %v1352_v46  ;;  %v1277_v62 = vsel %vm359_vm2, %v5684_v39, %v1276_v34  ;;  %v1348_v37 = vmax.f32 %v1214_v31, %v1275_v1  ;;  %v5685_v34 = vrot.slane %v4778_v29, 1  ;;  %v1242_v47 = vrot.slane %v4792_v41, 2 }
 0x273   :  { %1414 = vmatprep.subr.mxu0 %v1351_v24  ;;  %v1349_v28 = vmax.f32 %v1215_v44, %v1277_v62  ;;  %v1271_v19 = vsel %vm359_vm2, %v5686_v14, %v1270_v0  ;;  %v1199_v12 = vmax.f32 %v4752_v53, %v4907_v15  ;;  %v5687_v50 = vmax.f32 %v4265_v11, %v4766_v17 }
 0x274   :  { %v4977_v60 = vpop.permute.xlu1 %647  ;;  %1415 = vmatpush1.msra.mxu0 %v1350_v8  ;;  %v863_v42 = vpop.permute.xlu0 %862  ;;  %v1109_v55 = vsel %vm188_vm1, %v5685_v34, %v1108_v21  ;;  %v1346_v51 = vmax.f32 %v1212_v45, %v1271_v19  ;;  %v5688_v44 = vrot.slane %v4807_v36, 1  ;;  %v1113_v59 = vsel %vm188_vm1, %v1108_v21, %v1112_v54 }
 0x275   :  { %v957_v22 = vsel %vm952_vm8, %v863_v42, %v865_v57  ;;  %1416 = vmatprep.subr.mxu0 %v1349_v28  ;;  %v4994_v26 = vmax.f32 %v5687_v50, %v958_v4  ;;  %v1246_v57 = vrot.slane %v4893_v5, 2  ;;  %v1248_v46 = vrot.slane %v4895_v32, 2 }
 0x276   :  { %1417 = vmatpush1.msra.mxu0 %v1348_v37  ;;  %v1115_v10 = vsel %vm188_vm1, %v5688_v44, %v1114_v38  ;;  %v1198_v11 = vmax.f32 %v4778_v29, %v1109_v55  ;;  %v5689_v17 = vrot.slane %v4752_v53, 2  ;;  %v5690_v15 = vrot.slane %v4768_v40, 2  ;;  %v5698_v55 = vld [vmem:[#allocation8_spill] sm:$0xff] }
 0x277   :  { %1418 = vmatprep.subr.mxu0 %v4713_v27  ;;  %v1100_v31 = vrot.slane %v4975_v16, 1  ;;  %v5691_v0 = vmax.f32 %v4257_v9, %v4761_v49  ;;  %v5693_v27 = vrot.slane %v5692_v61, 1  ;;  %v751_v45 = vsel %vm747_vm7, %v4912_v63, %v4934_v35  ;;  %v5695_v9 = vld [vmem:[#allocation25_spill] sm:$0xff] }
 0x278   :  { %v1241_v20 = vsel %vm359_vm2, %v5690_v15, %v5689_v17  ;;  %v859_v52 = vpop.permute.xlu1 %858  ;;  %1419 = vmatpush1.msra.mxu0 %v1346_v51  ;;  %v650_v24 = vpop.permute.xlu0 %649  ;;  %v5694_v39 = vmov %v5689_v17  ;;  %v5696_v49 = vrot.slane %v5695_v9, 1  ;;  %v1201_v28 = vmax.f32 %v4807_v36, %v1115_v10  ;;  %v5701_v10 = vld [vmem:[#allocation27_spill] sm:$0xff] }
 0x279   :  { %v5015_v21 = vmax.f32 %v5691_v0, %v957_v22  ;;  %v1119_v8 = vsel %vm188_vm1, %v1114_v38, %v5693_v27  ;;  %v1245_v62 = vsel %vm359_vm2, %v5694_v39, %v1244_v56  ;;  %1420 = vmatprep.subr.mxu0 %v4670_v23  ;;  %v1200_v1 = vmax.f32 %v4792_v41, %v1113_v59 }
 0x27a   :  { %v1117_v4 = vsel %vm188_vm1, %v1112_v54, %v5696_v49  ;;  %v1098_v38 = vrot.slane %v4994_v26, 1  ;;  %1421 = vmatpush1.msra.mxu0 %v4672_v6  ;;  %v1333_v53 = vmax.f32 %v1199_v12, %v1245_v62  ;;  %v5697_v42 = vrot.slane %v4778_v29, 2 }
 0x27b   :  { %v5037_v35 = vmax.f32 %v1197_v30, %v1241_v20  ;;  %1422 = vmatprep.subr.mxu0 %v4631_v18  ;;  %v1203_v23 = vmax.f32 %v4895_v32, %v1119_v8  ;;  %v1249_v54 = vsel %vm359_vm2, %v1244_v56, %v1248_v46  ;;  %v1247_v36 = vsel %vm359_vm2, %v1242_v47, %v1246_v57 }
 0x27c   :  { %v1243_v37 = vsel %vm359_vm2, %v5697_v42, %v1242_v47  ;;  %v1105_v6 = vsel %vm188_vm1, %v1100_v31, %v5685_v34  ;;  %v819_v22 = vmax.f32 %v5698_v55, %v751_v45  ;;  %v1096_v14 = vrot.slane %v5015_v21, 1  ;;  %v646_v19 = vpop.permute.xlu1 %645  ;;  %1423 = vmatpush1.msra.mxu0 %v4633_v25  ;;  %v861_v30 = vpop.permute.xlu0 %860 }
 0x27d   :  { %v1332_v41 = vmax.f32 %v1198_v11, %v1243_v37  ;;  %v1202_v18 = vmax.f32 %v4893_v5, %v1117_v4  ;;  %v750_v32 = vsel %vm747_vm7, %v4953_v13, %v4912_v63  ;;  %v956_v56 = vsel %vm952_vm8, %v859_v52, %v861_v30  ;;  %1424 = vmatprep.subr.mxu0 %v4617_v43  ;;  %v5708_v37 = vld [vmem:[#allocation5_spill] sm:$0xff] }
 0x27e   :  { %v1335_v47 = vmax.f32 %v1201_v28, %v1249_v54  ;;  %v1334_v12 = vmax.f32 %v1200_v1, %v1247_v36  ;;  %v1234_v50 = vrot.slane %v4975_v16, 2  ;;  %v5056_v51 = vmax.f32 %v819_v22, %v956_v56  ;;  %1425 = vmatpush1.msra.mxu0 %v4619_v33  ;;  %v5703_v33 = vld [vmem:[#allocation7_spill] sm:$0xff]  ;;  %v5707_v1 = vld [vmem:[#allocation6_spill] sm:$0xff] }
 0x27f   :  { %v5699_v25 = vrot.slane %v5692_v61, 2  ;;  %v5700_v44 = vrot.slane %v4768_v40, 1  ;;  %v1196_v13 = vmax.f32 %v4975_v16, %v1105_v6  ;;  %v1232_v43 = vrot.slane %v4994_v26, 2  ;;  %1426 = vmatprep.subr.mxu0 %v5701_v10  ;;  %v5704_v61 = vld [vmem:[#allocation28_spill] sm:$0xff] }
 0x280   :  { %v5702_v11 = vrot.slane %v5695_v9, 2  ;;  %v818_v15 = vmax.f32 %v5703_v33, %v750_v32  ;;  %v1101_v20 = vsel %vm188_vm1, %v1096_v14, %v1100_v31  ;;  %v853_v0 = vpop.permute.xlu1 %852  ;;  %1427 = vmatpush1.msra.mxu0 %v5704_v61  ;;  %v857_v27 = vpop.permute.xlu0 %856  ;;  %v749_v8 = vsel %vm747_vm7, %v4977_v60, %v650_v24  ;;  %v3875_v61 = vld [vmem:[%s5604_s3 + $0x168] sm:$0xff]  }
 0x281   :  { %v1253_v5 = vsel %vm359_vm2, %v1248_v46, %v5699_v25  ;;  %v1103_v63 = vsel %vm188_vm1, %v1098_v38, %v5700_v44  ;;  %v1094_v46 = vrot.slane %v5056_v51, 1  ;;  %v748_v39 = vsel %vm747_vm7, %v646_v19, %v4977_v60 }
 0x282   :  { %v1337_v59 = vmax.f32 %v1203_v23, %v1253_v5  ;;  %v1251_v17 = vsel %vm359_vm2, %v1246_v57, %v5702_v11  ;;  %v955_v62 = vsel %vm952_vm8, %v857_v27, %v859_v52  ;;  %v1195_v57 = vmax.f32 %v4994_v26, %v1103_v63  ;;  %v1362_v27 = vld [vmem:[%s5603_s2 + $0x20] sm:$0xff] }
 0x283   :  { %v1336_v16 = vmax.f32 %v1202_v18, %v1251_v17  ;;  %v1230_v31 = vrot.slane %v5015_v21, 2  ;;  %v1023_v45 = vmax.f32 %v818_v15, %v955_v62  ;;  %v5705_v9 = vmov %v5697_v42  ;;  %v1367_v62 = vld [vmem:[%s5603_s2 + $0x48] sm:$0xff] }
 0x284   :  { %1428 = vmatprep.subr.mxu0 %v1337_v59  ;;  %v1239_v49 = vsel %vm359_vm2, %v1234_v50, %v5705_v9  ;;  %v1099_v4 = vsel %vm188_vm1, %v1094_v46, %v1098_v38  ;;  %v1194_v24 = vmax.f32 %v5015_v21, %v1101_v20  ;;  %v1228_v28 = vrot.slane %v5056_v51, 2  ;;  %v851_v36 = vpop.permute.xlu1 %850  ;;  %v855_v34 = vpop.permute.xlu0 %854  ;;  %v3869_v20 = vld [vmem:[%s5604_s3 + $0x138] sm:$0xff]   ;;  %v1371_v9 = vld [vmem:[%s5603_s2 + $0x68] sm:$0xff] }
 0x285   :  { %1429 = vmatpush1.msra.mxu0 %v1336_v16  ;;  %v1330_v60 = vmax.f32 %v1196_v13, %v1239_v49  ;;  %v5706_v52 = vrot.slane %v4768_v40, 2  ;;  %v817_v42 = vmax.f32 %v5707_v1, %v749_v8  ;;  %v816_v23 = vmax.f32 %v5708_v37, %v748_v39  ;;  %v3877_v16 = vld [vmem:[%s5604_s3 + $0x128] sm:$0xff]   ;;  %v1365_v8 = vld [vmem:[%s5603_s2 + $0x38] sm:$0xff]  ;;  %v1364_v39 = vld [vmem:[%s5603_s2 + $0x30] sm:$0xff] }
 0x286   :  { %1430 = vmatprep.subr.mxu0 %v1335_v47  ;;  %v1091_v54 = vrot.slane %v1023_v45, 1  ;;  %v1225_v29 = vrot.slane %v1023_v45, 2  ;;  %v953_v38 = vsel %vm952_vm8, %v851_v36, %v853_v0  ;;  %v954_v21 = vsel %vm952_vm8, %v853_v0, %v855_v34  ;;  %v1363_v0 = vld [vmem:[%s5603_s2 + $0x28] sm:$0xff]  ;;  %v1370_v49 = vld [vmem:[%s5603_s2 + $0x60] sm:$0xff]  ;;  %v3883_v37 = vld [vmem:[%s5604_s3 + $0x158] sm:$0xff]  }
 0x287   :  { %v1237_v26 = vsel %vm359_vm2, %v1232_v43, %v5706_v52  ;;  %1431 = vmatpush1.msra.mxu0 %v1334_v12  ;;  %v1193_v55 = vmax.f32 %v5056_v51, %v1099_v4  ;;  %v1021_v22 = vmax.f32 %v816_v23, %v953_v38  ;;  %v1022_v19 = vmax.f32 %v817_v42, %v954_v21  ;;  %v1373_v4 = vld [vmem:[%s5603_s2 + $0x78] sm:$0xff]  ;;  %v3879_v52 = vld [vmem:[%s5604_s3 + $0x160] sm:$0xff]   ;;  %v3882_v42 = vld [vmem:[%s5604_s3 + $0x8] sm:$0xff]  }
 0x288   :  { %1432 = vmatprep.subr.mxu0 %v1333_v53  ;;  %v1329_v6 = vmax.f32 %v1195_v57, %v1237_v26  ;;  %v1097_v40 = vsel %vm188_vm1, %v1091_v54, %v1096_v14  ;;  %v1235_v30 = vsel %vm359_vm2, %v1230_v31, %v1234_v50  ;;  %v1233_v56 = vsel %vm359_vm2, %v1228_v28, %v1232_v43  ;;  %v1366_v57 = vld [vmem:[%s5603_s2 + $0x40] sm:$0xff]  ;;  %v3880_v26 = vld [vmem:[%s5604_s3 + $0x48] sm:$0xff]   ;;  %v3887_v36 = vld [vmem:[%s5604_s3 + $0x150] sm:$0xff]  }
 0x289   :  { %1433 = vmatpush1.msra.mxu0 %v1332_v41  ;;  %v1192_v18 = vmax.f32 %v1023_v45, %v1097_v40  ;;  %v1328_v32 = vmax.f32 %v1194_v24, %v1235_v30  ;;  %v1231_v47 = vsel %vm359_vm2, %v1225_v29, %v1230_v31  ;;  %v1090_v12 = vrot.slane %v1021_v22, 1  ;;  %v1369_v31 = vld [vmem:[%s5603_s2 + $0x58] sm:$0xff]  ;;  %v1368_v45 = vld [vmem:[%s5603_s2 + $0x50] sm:$0xff]  ;;  %v3881_v1 = vld [vmem:[%s5604_s3 + $0x120] sm:$0xff]   ;;  %3515 = vmatprep.subr.bf16.mxu1 %v3880_v26 }
 0x28a   :  { %1434 = vmatprep.subr.mxu0 %v5037_v35  ;;  %v1224_v53 = vrot.slane %v1021_v22, 2  ;;  %v1093_v25 = vrot.slane %v1022_v19, 1  ;;  %v1227_v5 = vrot.slane %v1022_v19, 2  ;;  %v1327_v14 = vmax.f32 %v1193_v55, %v1233_v56  ;;  %v1372_v24 = vld [vmem:[%s5603_s2 + $0x70] sm:$0xff]  ;;  %3516 = vmatpush3.bf16.msra.mxu1 %v3882_v42  ;;  %v3884_v23 = vld [vmem:[%s5604_s3 + $0x40] sm:$0xff]   ;;  %v3888_v34 = vld [vmem:[%s5604_s3 + $0xf8] sm:$0xff]  }
 0x28b   :  { %1435 = vmatpush1.msra.mxu0 %v1330_v60  ;;  %v1326_v51 = vmax.f32 %v1192_v18, %v1231_v47  ;;  %v1092_v41 = vsel %vm188_vm1, %v1090_v12, %v1091_v54  ;;  %v1223_v35 = vmax.f32 %v4891_v58, %v1154_v48  ;;  %v1222_v13 = vmax.f32 %v4889_v2, %v1152_v3  ;;  %v3867_v48 = vld [vmem:[%s5604_s3 + $0x178] sm:$0xff]   ;;  %v1358_v3 = vld [vmem:[%s5603_s2] sm:$0xff]  ;;  %v3871_v2 = vld [vmem:[%s5604_s3 + $0x170] sm:$0xff]  }
 0x28c   :  { %1436 = vmatprep.subr.mxu0 %v1329_v6  ;;  %v1095_v50 = vsel %vm188_vm1, %v1093_v25, %v1094_v46  ;;  %v1190_v44 = vmax.f32 %v1021_v22, %v1092_v41  ;;  %v1229_v43 = vsel %vm359_vm2, %v1227_v5, %v1228_v28  ;;  %v1226_v10 = vsel %vm359_vm2, %v1224_v53, %v1225_v29  ;;  %v3873_v46 = vld [vmem:[%s5604_s3 + $0x130] sm:$0xff]   ;;  %v1375_v28 = vld [vmem:[%s5603_s2 + $0x88] sm:$0x3]  ;;  %v1374_v60 = vld [vmem:[%s5603_s2 + $0x80] sm:$0x3] }
 0x28d   :  { %1437 = vmatpush1.msra.mxu0 %v1328_v32  ;;  %v1191_v63 = vmax.f32 %v1022_v19, %v1095_v50  ;;  %v5709_v17 = vrot.slane %v4891_v58, 2  ;;  %v1356_v15 = vmax.f32 %v1222_v13, %v1286_v7  ;;  %v1361_v58 = vld [vmem:[%s5603_s2 + $0x18] sm:$0xff]  ;;  %v1360_v7 = vld [vmem:[%s5603_s2 + $0x10] sm:$0xff]  ;;  %v3886_v29 = vld [vmem:[%s5604_s3] sm:$0xff]   ;;  %3517 = vmatprep.subr.bf16.mxu1 %v3884_v23 }
 0x28e   :  { %1438 = vmatprep.subr.mxu0 %v1327_v14  ;;  %v1324_v11 = vmax.f32 %v1190_v44, %v1226_v10  ;;  %v3885_v54 = vld [vmem:[%s5604_s3 + $0x118] sm:$0xff]   ;;  %3518 = vmatpush3.bf16.msra.mxu1 %v3886_v29  ;;  %v3889_v38 = vld [vmem:[%s5604_s3 + $0x110] sm:$0xff]   ;;  %v3891_v21 = vld [vmem:[%s5604_s3 + $0x148] sm:$0xff]  }
 0x28f   :  { %1439 = vmatpush1.msra.mxu0 %v1326_v51  ;;  %v1325_v59 = vmax.f32 %v1191_v63, %v1229_v43  ;;  %v1357_v33 = vmax.f32 %v1223_v35, %v5709_v17  ;;  %3543 = vmatprep.subr.bf16.mxu1 %v3888_v34  ;;  %v3893_v6 = vld [vmem:[%s5604_s3 + $0x108] sm:$0xff]   ;;  %v3895_v55 = vld [vmem:[%s5604_s3 + $0x140] sm:$0xff]   ;;  %v3890_v56 = vld [vmem:[%s5604_s3 + $0xb8] sm:$0xff]  }
 0x290   :  { %v3897_v40 = vld [vmem:[%s5604_s3 + $0x100] sm:$0xff]   ;;  %v3892_v53 = vld [vmem:[%s5604_s3 + $0xf0] sm:$0xff]   ;;  %v3896_v51 = vld [vmem:[%s5604_s3 + $0xe8] sm:$0xff]  }
 0x291   :  { %1440 = vmatprep.subr.mxu0 %v1325_v59  ;;  %v3894_v5 = vld [vmem:[%s5604_s3 + $0xb0] sm:$0xff]   ;;  %v3898_v44 = vld [vmem:[%s5604_s3 + $0xa8] sm:$0xff]   ;;  %v3899_v43 = vld [vmem:[%s5604_s3 + $0xe0] sm:$0xff]  }
 0x292   :  { %1441 = vmatpush1.msra.mxu0 %v1324_v11  ;;  %v3906_v42 = vld [vmem:[%s5604_s3 + $0x88] sm:$0xff]   ;;  %v3907_v29 = vld [vmem:[%s5604_s3 + $0xc0] sm:$0xff]  }
 0x293   :  { %3364 = vmatprep.subr.msk.mxu0 %vm359_vm2, %v1357_v33 }
 0x294   :  { %3365 = vmatpush2.msk.msra.mxu0 %vm359_vm2, %v1356_v15 }
 0x295   :  { %1475 = vmatmul.mubr.f32.vlgmr.msra.gmra.mxu0 %v1358_v3  ;;  %3583 = vmatprep.subr.bf16.mxu0 %v3867_v48  ;;  %v3900_v48 = vld [vmem:[%s5604_s3 + $0xa0] sm:$0xff]  }
 0x296   :  { %3367 = vmatprep.mubr.msk.f32.mxu0 %vm1376_vm9, %v1361_v58  ;;  %3584 = vmatpush3.bf16.msra.mxu0 %v3869_v20  ;;  %v3901_v20 = vld [vmem:[%s5604_s3 + $0xd8] sm:$0xff]  }
 0x297   :  { %3585 = vmatprep.subr.bf16.mxu0 %v3871_v2 }
 0x299   :  { %1481 = vmatmul.mubr.f32.gmra.mxu0 %v1360_v7 }
 0x29a   :  { %3368 = vmatprep.mubr.msk.f32.mxu0 %vm1376_vm9, %v1363_v0  ;;  %3586 = vmatpush3.bf16.msra.mxu0 %v3873_v46  ;;  %v3902_v46 = vld [vmem:[%s5604_s3 + $0x98] sm:$0xff]  }
 0x29b   :  { %3587 = vmatprep.subr.bf16.mxu0 %v3875_v61 }
 0x29d   :  { %1487 = vmatmul.mubr.f32.gmra.mxu0 %v1362_v27 }
 0x29e   :  { %3369 = vmatprep.mubr.msk.f32.mxu0 %vm1376_vm9, %v1365_v8  ;;  %3588 = vmatpush3.bf16.msra.mxu0 %v3877_v16  ;;  %v3903_v16 = vld [vmem:[%s5604_s3 + $0xd0] sm:$0xff]  }
 0x29f   :  { %3589 = vmatprep.subr.bf16.mxu0 %v3879_v52 }
 0x2a1   :  { %1493 = vmatmul.mubr.f32.gmra.mxu0 %v1364_v39 }
 0x2a2   :  { %3370 = vmatprep.mubr.msk.f32.mxu0 %vm1376_vm9, %v1367_v62  ;;  %3590 = vmatpush3.bf16.msra.mxu0 %v3881_v1 }
 0x2a3   :  { %3591 = vmatprep.subr.bf16.mxu0 %v3883_v37 }
 0x2a5   :  { %1499 = vmatmul.mubr.f32.gmra.mxu0 %v1366_v57 }
 0x2a6   :  { %3371 = vmatprep.mubr.msk.f32.mxu0 %vm1376_vm9, %v1369_v31  ;;  %3592 = vmatpush3.bf16.msra.mxu0 %v3885_v54  ;;  %v3904_v31 = vld [vmem:[%s5604_s3 + $0x90] sm:$0xff]  }
 0x2a7   :  { %3593 = vmatprep.subr.bf16.mxu0 %v3887_v36 }
 0x2a9   :  { %1505 = vmatmul.mubr.f32.gmra.mxu0 %v1368_v45 }
 0x2aa   :  { %3372 = vmatprep.mubr.msk.f32.mxu0 %vm1376_vm9, %v1371_v9  ;;  %3594 = vmatpush3.bf16.msra.mxu0 %v3889_v38 }
 0x2ab   :  { %3595 = vmatprep.subr.bf16.mxu0 %v3891_v21 }
 0x2ad   :  { %1511 = vmatmul.mubr.f32.gmra.mxu0 %v1370_v49  ;;  %v3905_v49 = vld [vmem:[%s5604_s3 + $0xc8] sm:$0xff]  }
 0x2ae   :  { %3373 = vmatprep.mubr.msk.f32.mxu0 %vm1376_vm9, %v1373_v4  ;;  %3596 = vmatpush3.bf16.msra.mxu0 %v3893_v6 }
 0x2af   :  { %3597 = vmatprep.subr.bf16.mxu0 %v3895_v55 }
 0x2b1   :  { %1517 = vmatmul.mubr.f32.gmra.mxu0 %v1372_v24 }
 0x2b2   :  { %3374 = vmatprep.mubr.msk.f32.mxu0 %vm1376_vm9, %v1375_v28  ;;  %3598 = vmatpush3.bf16.msra.mxu0 %v3897_v40 }
 0x2b5   :  { %1523 = vmatmul.mubr.f32.gmra.mxu0 %v1374_v60 }
 0x355   :  { %v1476_v22 = vpop.f32.mrf.mxu0 }
 0x357   :  { %v1478_v19 = vpop.f32.mrf.mxu0 }
 0x359   :  { %v1482_v30 = vpop.f32.mrf.mxu0 }
 0x35a   :  { %v5244_v47 = vpack.c.bf16 %v1482_v30, %v1476_v22 }
 0x35b   :  { %v1484_v18 = vpop.f32.mrf.mxu0 }
 0x35c   :  { %v5239_v32 = vpack.c.bf16 %v1484_v18, %v1478_v19  ;;  %v1629_v11 = vrot.slane %v5244_v47, 1  ;;  %v1542_v26 = vshll.u32 %v5244_v47, 16  ;;  %v3908_v19 = vld [vmem:[%s5604_s3 + $0x80] sm:$0xff]   ;;  %s3968_s3 = smov 120  }
 0x35d   :  { %v1488_v12 = vpop.f32.mrf.mxu0 }
 0x35e   :  { %2071 = vmatprep.mubr.bf16.mxu1 %v5239_v32  ;;  %v1632_v10 = vrot.slane %v5239_v32, 1  ;;  %v1554_v0 = vshll.u32 %v5239_v32, 16  ;;  %v1552_v60 = vshrl.u32 %v5239_v32, 16  ;;  %v1544_v55 = vrot.slane %v1542_v26, 1 }
 0x35f   :  { %v1490_v25 = vpop.f32.mrf.mxu0  ;;  %2072 = vmatmul.mubr.bf16.vlgmr.msra.gmra.mxu1 %v5244_v47  ;;  %v1540_v32 = vshrl.u32 %v5244_v47, 16 }
 0x360   :  { %3544 = vmatpush3.bf16.msra.mxu1 %v3890_v56  ;;  %v1556_v4 = vrot.slane %v1554_v0, 1 }
 0x361   :  { %v1494_v14 = vpop.f32.mrf.mxu0  ;;  %3545 = vmatprep.subr.bf16.mxu1 %v3892_v53 }
 0x362   :  { %v5257_v41 = vpack.c.bf16 %v1494_v14, %v1488_v12  ;;  %v1557_v37 = vor.u32 %v1556_v4, %v1552_v60 }
 0x363   :  { %v1496_v50 = vpop.f32.mrf.mxu0 }
 0x364   :  { %v5259_v35 = vpack.c.bf16 %v1496_v50, %v1490_v25  ;;  %3546 = vmatpush3.bf16.msra.mxu1 %v3894_v5  ;;  %v1630_v63 = vrot.slane %v5257_v41, 1  ;;  %v1547_v36 = vshll.u32 %v5257_v41, 16  ;;  %v1545_v5 = vor.u32 %v1544_v55, %v1540_v32 }
 0x365   :  { %v1500_v13 = vpop.f32.mrf.mxu0  ;;  %3547 = vmatprep.subr.bf16.mxu1 %v3896_v51 }
 0x366   :  { %2079 = vmatprep.mubr.bf16.mxu1 %v5259_v35  ;;  %v1633_v59 = vrot.slane %v5259_v35, 1  ;;  %v1631_v3 = vsel %vm188_vm1, %v1629_v11, %v1630_v63  ;;  %v1559_v62 = vshll.u32 %v5259_v35, 16  ;;  %v1549_v56 = vrot.slane %v1547_v36, 1 }
 0x367   :  { %v1502_v17 = vpop.f32.mrf.mxu0  ;;  %2080 = vmatmul.mubr.bf16.gmra.mxu1 %v5257_v41  ;;  %v1571_v53 = vshrl.u32 %v5259_v35, 16 }
 0x368   :  { %3548 = vmatpush3.bf16.msra.mxu1 %v3898_v44  ;;  %v1634_v33 = vsel %vm188_vm1, %v1632_v10, %v1633_v59  ;;  %v1561_v52 = vrot.slane %v1559_v62, 1  ;;  %v1550_v44 = vsel %vm98_vm0, %v1545_v5, %v1549_v56 }
 0x369   :  { %v1506_v15 = vpop.f32.mrf.mxu0  ;;  %2201 = vmatprep.mubr.bf16.mxu0 %v1634_v33  ;;  %3549 = vmatprep.subr.bf16.mxu1 %v3899_v43  ;;  %v1563_v43 = vshrl.u32 %v5257_v41, 16 }
 0x36a   :  { %v5281_v58 = vpack.c.bf16 %v1506_v15, %v1500_v13  ;;  %2202 = vmatmul.mubr.bf16.vlgmr.msra.gmra.mxu0 %v1631_v3  ;;  %v1562_v38 = vsel %vm98_vm0, %v1557_v37, %v1561_v52  ;;  %v1573_v50 = vor.u32 %v1571_v53, %v1561_v52 }
 0x36b   :  { %v1508_v2 = vpop.f32.mrf.mxu0 }
 0x36c   :  { %v5283_v7 = vpack.c.bf16 %v1508_v2, %v1502_v17  ;;  %3550 = vmatpush3.bf16.msra.mxu1 %v3900_v48  ;;  %v1635_v27 = vrot.slane %v5281_v58, 1  ;;  %v1565_v17 = vor.u32 %v1563_v43, %v1549_v56  ;;  %v1579_v2 = vshrl.u32 %v5281_v58, 16 }
 0x36d   :  { %v1512_v61 = vpop.f32.mrf.mxu0  ;;  %3551 = vmatprep.subr.bf16.mxu1 %v3901_v20 }
 0x36e   :  { %2087 = vmatprep.mubr.bf16.mxu1 %v5283_v7  ;;  %v1637_v8 = vrot.slane %v5283_v7, 1  ;;  %v1636_v9 = vsel %vm188_vm1, %v1630_v63, %v1635_v27  ;;  %v1575_v6 = vshll.u32 %v5283_v7, 16  ;;  %v1567_v63 = vshll.u32 %v5281_v58, 16 }
 0x36f   :  { %v1514_v39 = vpop.f32.mrf.mxu0  ;;  %2088 = vmatmul.mubr.bf16.gmra.mxu1 %v5281_v58 }
 0x370   :  { %3552 = vmatpush3.bf16.msra.mxu1 %v3902_v46  ;;  %v1638_v57 = vsel %vm188_vm1, %v1633_v59, %v1637_v8  ;;  %v1577_v25 = vrot.slane %v1575_v6, 1  ;;  %v1569_v10 = vrot.slane %v1567_v63, 1  ;;  %v1587_v59 = vshrl.u32 %v5283_v7, 16 }
 0x371   :  { %v1518_v45 = vpop.f32.mrf.mxu0  ;;  %2209 = vmatprep.mubr.bf16.mxu0 %v1638_v57  ;;  %3553 = vmatprep.subr.bf16.mxu1 %v3903_v16 }
 0x372   :  { %v5305_v24 = vpack.c.bf16 %v1518_v45, %v1512_v61  ;;  %2210 = vmatmul.mubr.bf16.gmra.mxu0 %v1636_v9  ;;  %v1578_v47 = vsel %vm98_vm0, %v1573_v50, %v1577_v25  ;;  %v1589_v33 = vor.u32 %v1587_v59, %v1577_v25  ;;  %v1570_v48 = vsel %vm98_vm0, %v1565_v17, %v1569_v10 }
 0x373   :  { %v1520_v28 = vpop.f32.mrf.mxu0  ;;  %v1581_v61 = vor.u32 %v1579_v2, %v1569_v10 }
 0x374   :  { %v5309_v1 = vpack.c.bf16 %v1520_v28, %v1514_v39  ;;  %3554 = vmatpush3.bf16.msra.mxu1 %v3904_v31  ;;  %v1639_v54 = vrot.slane %v5305_v24, 1  ;;  %v1583_v15 = vshll.u32 %v5305_v24, 16  ;;  %v1595_v62 = vshrl.u32 %v5305_v24, 16 }
 0x375   :  { %3555 = vmatprep.subr.bf16.mxu1 %v3905_v49  ;;  %v1524_v23 = vpop.f32.mrf.mxu0 }
 0x376   :  { %2095 = vmatprep.mubr.bf16.mxu1 %v5309_v1  ;;  %v1641_v34 = vrot.slane %v5309_v1, 1  ;;  %v1537_v30 = vpack.c.bf16 %v1524_v23, %v1524_v23  ;;  %v1640_v18 = vsel %vm188_vm1, %v1635_v27, %v1639_v54  ;;  %v1591_v13 = vshll.u32 %v5309_v1, 16 }
 0x377   :  { %2096 = vmatmul.mubr.bf16.gmra.mxu1 %v5305_v24  ;;  %v1526_v21 = vpop.f32.mrf.mxu0  ;;  %v1585_v46 = vrot.slane %v1583_v15, 1  ;;  %v1603_v41 = vshrl.u32 %v5309_v1, 16 }
 0x378   :  { %3556 = vmatpush3.bf16.msra.mxu1 %v3906_v42  ;;  %2136 = vmatprep.mubr.bf16.mxu1 %v1562_v38  ;;  %v1642_v40 = vsel %vm188_vm1, %v1637_v8, %v1641_v34  ;;  %v1538_v22 = vpack.c.bf16 %v1526_v21, %v1526_v21  ;;  %v1643_v51 = vrot.slane %v1537_v30, 1  ;;  %v1593_v11 = vrot.slane %v1591_v13, 1 }
 0x379   :  { %2217 = vmatprep.mubr.bf16.mxu0 %v1642_v40  ;;  %3557 = vmatprep.subr.bf16.mxu1 %v3907_v29  ;;  %v1599_v27 = vshll.u32 %v1537_v30, 16  ;;  %v1586_v16 = vsel %vm98_vm0, %v1581_v61, %v1585_v46  ;;  %v1597_v57 = vor.u32 %v1595_v62, %v1585_v46 }
 0x37a   :  { %2218 = vmatmul.mubr.bf16.gmra.mxu0 %v1640_v18  ;;  %v1645_v12 = vrot.slane %v1538_v22, 1  ;;  %v1644_v35 = vsel %vm188_vm1, %v1639_v54, %v1643_v51  ;;  %v1607_v3 = vshll.u32 %v1538_v22, 16  ;;  %v1594_v20 = vsel %vm98_vm0, %v1589_v33, %v1593_v11 }
 0x37b   :  { %v1605_v7 = vor.u32 %v1603_v41, %v1593_v11  ;;  %v1601_v39 = vrot.slane %v1599_v27, 1 }
 0x37c   :  { %3558 = vmatpush3.bf16.msra.mxu1 %v3908_v19  ;;  %v1646_v14 = vsel %vm188_vm1, %v1641_v34, %v1645_v12  ;;  %v1609_v0 = vrot.slane %v1607_v3, 1 }
 0x37d   :  { %2225 = vmatprep.mubr.bf16.mxu0 %v1646_v14  ;;  %v1602_v31 = vsel %vm98_vm0, %v1597_v57, %v1601_v39 }
 0x37e   :  { %v1610_v8 = vsel %vm98_vm0, %v1605_v7, %v1609_v0 }
 0x37f   :  { %2137 = vmatmul.mubr.bf16.vlgmr.msra.gmra.mxu1 %v1550_v44 }
 0x380   :  { %2144 = vmatprep.mubr.bf16.mxu1 %v1578_v47 }
 0x382   :  { %2226 = vmatmul.mubr.bf16.gmra.mxu0 %v1644_v35 }
 0x387   :  { %2145 = vmatmul.mubr.bf16.gmra.mxu1 %v1570_v48 }
 0x388   :  { %2152 = vmatprep.mubr.bf16.mxu1 %v1594_v20 }
 0x38f   :  { %2153 = vmatmul.mubr.bf16.gmra.mxu1 %v1586_v16 }
 0x390   :  { %2160 = vmatprep.mubr.bf16.mxu1 %v1610_v8 }
 0x397   :  { %2161 = vmatmul.mubr.bf16.gmra.mxu1 %v1602_v31 }
 0x41f   :  { %v3519_v58 = vpop.f32.mrf.mxu1 }
 0x421   :  { %v3520_v45 = vpop.f32.mrf.mxu1 }
 0x422   :  { %v5348_v9 = vadd.f32 %v3520_v45, %v3519_v58 }
 0x423   :  { %v5350_v49 = vpop.f32.mrf.mxu1 }
 0x425   :  { %v5352_v4 = vpop.f32.mrf.mxu1 }
 0x427   :  { %v5354_v28 = vpop.f32.mrf.mxu1 }
 0x429   :  { %v5356_v60 = vpop.f32.mrf.mxu1 }
 0x42a   :  { %v5358_v52 = vpop.f32.mrf.mxu0  ;;  %v3527_v45 = vadd.f32 %v5356_v60, %v5354_v28 }
 0x42b   :  { %v3528_v26 = vpop.f32.mrf.mxu1 }
 0x42c   :  { %v5360_v24 = vpop.f32.mrf.mxu0 }
 0x42d   :  { %v3529_v1 = vpop.f32.mrf.mxu1 }
 0x42e   :  { %v5362_v42 = vpop.f32.mrf.mxu0  ;;  %v3530_v63 = vadd.f32 %v3529_v1, %v3528_v26 }
 0x42f   :  { %v3531_v37 = vpop.f32.mrf.mxu1 }
 0x430   :  { %v5364_v23 = vpop.f32.mrf.mxu0 }
 0x431   :  { %v3532_v54 = vpop.f32.mrf.mxu1 }
 0x432   :  { %v5366_v29 = vpop.f32.mrf.mxu0  ;;  %v3533_v11 = vadd.f32 %v3532_v54, %v3531_v37 }
 0x433   :  { %v3534_v36 = vpop.f32.mrf.mxu1 }
 0x434   :  { %v5368_v34 = vpop.f32.mrf.mxu0 }
 0x435   :  { %v3535_v38 = vpop.f32.mrf.mxu1 }
 0x436   :  { %v3608_v6 = vpop.f32.mrf.mxu0  ;;  %v3536_v46 = vadd.f32 %v3535_v38, %v3534_v36 }
 0x437   :  { %v3537_v21 = vpop.f32.mrf.mxu1 }
 0x438   :  { %v3609_v22 = vpop.f32.mrf.mxu0 }
 0x439   :  { %v3538_v55 = vpop.f32.mrf.mxu1  ;;  %v3610_v35 = vadd.f32 %v3609_v22, %v3608_v6 }
 0x43a   :  { %v3611_v18 = vpop.f32.mrf.mxu0  ;;  %v3539_v39 = vadd.f32 %v3538_v55, %v3537_v21  ;;  %v3524_v55 = vadd.f32 %v5352_v4, %v5350_v49 }
 0x43b   :  { %v3540_v40 = vpop.f32.mrf.mxu1 }
 0x43c   :  { %v3612_v12 = vpop.f32.mrf.mxu0 }
 0x43d   :  { %v3541_v19 = vpop.f32.mrf.mxu1  ;;  %v3613_v15 = vadd.f32 %v3612_v12, %v3611_v18  ;;  %v3607_v18 = vadd.f32 %v5368_v34, %v5366_v29  ;;  %v3601_v29 = vadd.f32 %v5360_v24, %v5358_v52 }
 0x43e   :  { %v3614_v5 = vpop.f32.mrf.mxu0  ;;  %v3542_v37 = vadd.f32 %v3541_v19, %v3540_v40 }
 0x43f   :  { %v3559_v30 = vpop.f32.mrf.mxu1 }
 0x440   :  { %v3615_v50 = vpop.f32.mrf.mxu0 }
 0x441   :  { %v3560_v32 = vpop.f32.mrf.mxu1  ;;  %v3616_v7 = vadd.f32 %v3615_v50, %v3614_v5 }
 0x442   :  { %v3617_v10 = vpop.f32.mrf.mxu0  ;;  %v3561_v12 = vadd.f32 %v3560_v32, %v3559_v30 }
 0x443   :  { %v3562_v56 = vpop.f32.mrf.mxu1 }
 0x444   :  { %v3618_v20 = vpop.f32.mrf.mxu0  ;;  %v2139_v49 = vadd.f32 %v3561_v12, %v5348_v9  ;;  %v2376_v9 = vld [vmem:[%s5605_s4] sm:$0xff] }
 0x445   :  { %v3563_v53 = vpop.f32.mrf.mxu1  ;;  %v3619_v26 = vadd.f32 %v3618_v20, %v3617_v10  ;;  %3751 = vmatprep.mubr.msk.f32.mxu1 %vm2380_vm10, %v2376_v9 }
 0x446   :  { %v3620_v16 = vpop.f32.mrf.mxu0  ;;  %v3564_v38 = vadd.f32 %v3563_v53, %v3562_v56  ;;  %v3604_v53 = vadd.f32 %v5364_v23, %v5362_v42  ;;  %v2204_v34 = vadd.f32 %v3601_v29, %v2139_v49 }
 0x447   :  { %v3565_v25 = vpop.f32.mrf.mxu1 }
 0x448   :  { %v3621_v54 = vpop.f32.mrf.mxu0  ;;  %v2142_v40 = vadd.f32 %v3564_v38, %v3524_v55 }
 0x449   :  { %v3566_v14 = vpop.f32.mrf.mxu1  ;;  %v3622_v28 = vadd.f32 %v3621_v54, %v3620_v16 }
 0x44a   :  { %v3567_v62 = vadd.f32 %v3566_v14, %v3565_v25  ;;  %v5398_v4 = vadd.f32 %v3604_v53, %v2142_v40 }
 0x44b   :  { %v3568_v51 = vpop.f32.mrf.mxu1 }
 0x44c   :  { %v2147_v6 = vadd.f32 %v3567_v62, %v3527_v45 }
 0x44d   :  { %v3569_v44 = vpop.f32.mrf.mxu1 }
 0x44e   :  { %v3570_v47 = vadd.f32 %v3569_v44, %v3568_v51  ;;  %v5390_v19 = vadd.f32 %v3607_v18, %v2147_v6 }
 0x44f   :  { %v3571_v13 = vpop.f32.mrf.mxu1 }
 0x450   :  { %v2150_v43 = vadd.f32 %v3570_v47, %v3530_v63 }
 0x451   :  { %v3572_v59 = vpop.f32.mrf.mxu1 }
 0x452   :  { %v5370_v17 = vadd.f32 %v3610_v35, %v2150_v43  ;;  %v3573_v33 = vadd.f32 %v3572_v59, %v3571_v13 }
 0x453   :  { %v3574_v48 = vpop.f32.mrf.mxu1 }
 0x454   :  { %v2155_v3 = vadd.f32 %v3573_v33, %v3533_v11  ;;  %2248 = vrot.lane.b32.xlu1 %v5370_v17, %s3968_s3 }
 0x455   :  { %v3575_v2 = vpop.f32.mrf.mxu1 }
 0x456   :  { %v5374_v0 = vadd.f32 %v3613_v15, %v2155_v3  ;;  %v3576_v41 = vadd.f32 %v3575_v2, %v3574_v48 }
 0x457   :  { %v3577_v61 = vpop.f32.mrf.mxu1 }
 0x458   :  { %v2158_v27 = vadd.f32 %v3576_v41, %v3536_v46  ;;  %2282 = vrot.lane.b32.xlu0 %v5374_v0, %s3966_s0  ;;  %2250 = vrot.lane.b32.xlu1 %v5374_v0, %s3968_s3 }
 0x459   :  { %v3578_v8 = vpop.f32.mrf.mxu1 }
 0x45a   :  { %v2223_v57 = vadd.f32 %v3616_v7, %v2158_v27  ;;  %v3579_v31 = vadd.f32 %v3578_v8, %v3577_v61 }
 0x45b   :  { %v3580_v58 = vpop.f32.mrf.mxu1 }
 0x45c   :  { %v2163_v1 = vadd.f32 %v3579_v31, %v3539_v39  ;;  %2284 = vrot.lane.b32.xlu0 %v2223_v57, %s3966_s0  ;;  %2252 = vrot.lane.b32.xlu1 %v2223_v57, %s3968_s3 }
 0x45d   :  { %v3581_v36 = vpop.f32.mrf.mxu1 }
 0x45e   :  { %v2228_v22 = vadd.f32 %v3619_v26, %v2163_v1  ;;  %v3582_v21 = vadd.f32 %v3581_v36, %v3580_v58 }
 0x460   :  { %v2166_v60 = vadd.f32 %v3582_v21, %v3542_v37  ;;  %2286 = vrot.lane.b32.xlu0 %v2228_v22, %s3966_s0  ;;  %2254 = vrot.lane.b32.xlu1 %v2228_v22, %s3968_s3 }
 0x462   :  { %v2231_v56 = vadd.f32 %v3622_v28, %v2166_v60 }
 0x464   :  { %2256 = vrot.lane.b32.xlu0 %v2231_v56, %s3968_s3  ;;  %2246 = vrot.lane.b32.xlu1 %v5390_v19, %s3968_s3 }
 0x468   :  { %2288 = vrot.lane.b32.xlu0 %v2231_v56, %s3966_s0  ;;  %2244 = vrot.lane.b32.xlu1 %v5398_v4, %s3968_s3 }
 0x46c   :  { %2280 = vrot.lane.b32.xlu0 %v5370_v17, %s3966_s0  ;;  %2242 = vrot.lane.b32.xlu1 %v2204_v34, %s3968_s3 }
 0x470   :  { %2278 = vrot.lane.b32.xlu0 %v5390_v19, %s3966_s0  ;;  %2274 = vrot.lane.b32.xlu1 %v2204_v34, %s3966_s0 }
 0x474   :  { %2276 = vrot.lane.b32.xlu0 %v5398_v4, %s3966_s0 }
 0x4c6   :  { %v2249_v52 = vpop.permute.xlu1 %2248 }
 0x4c7   :  { %v2269_v48 = vmax.f32 %v5370_v17, %v2249_v52 }
 0x4ca   :  { %v2283_v24 = vpop.permute.xlu0 %2282  ;;  %v2251_v42 = vpop.permute.xlu1 %2250 }
 0x4cb   :  { %v2270_v51 = vmax.f32 %v5374_v0, %v2251_v42 }
 0x4cd   :  { %v2302_v35 = vmax.f32 %v2270_v51, %v2283_v24 }
 0x4ce   :  { %v2285_v23 = vpop.permute.xlu0 %2284  ;;  %v2253_v30 = vpop.permute.xlu1 %2252 }
 0x4cf   :  { %v2271_v14 = vmax.f32 %v2223_v57, %v2253_v30  ;;  %v2321_v20 = vrot.slane %v2302_v35, 1  ;;  %v2352_v54 = vrot.slane %v2302_v35, 2 }
 0x4d1   :  { %v2303_v47 = vmax.f32 %v2271_v14, %v2285_v23 }
 0x4d2   :  { %v2287_v32 = vpop.permute.xlu0 %2286  ;;  %v2255_v25 = vpop.permute.xlu1 %2254 }
 0x4d3   :  { %v2272_v5 = vmax.f32 %v2228_v22, %v2255_v25  ;;  %v2323_v33 = vrot.slane %v2303_v47, 1  ;;  %v2354_v58 = vrot.slane %v2303_v47, 2 }
 0x4d5   :  { %v2304_v50 = vmax.f32 %v2272_v5, %v2287_v32  ;;  %v2324_v39 = vsel %vm188_vm1, %v2321_v20, %v2323_v33 }
 0x4d6   :  { %v2257_v44 = vpop.permute.xlu0 %2256  ;;  %v2247_v63 = vpop.permute.xlu1 %2246  ;;  %v2341_v6 = vmax.f32 %v2302_v35, %v2324_v39  ;;  %v2378_v35 = vld [vmem:[%s5605_s4 + $0x10] sm:$0xff]  ;;  %v5710_v39 = vmov 0.0  }
 0x4d7   :  { %v2273_v13 = vmax.f32 %v2231_v56, %v2257_v44  ;;  %v2325_v43 = vrot.slane %v2304_v50, 1  ;;  %v2356_v41 = vrot.slane %v2304_v50, 2  ;;  %v2268_v16 = vmax.f32 %v5390_v19, %v2247_v63 }
 0x4d8   :  { %v2355_v56 = vsel %vm359_vm2, %v2352_v54, %v2354_v58 }
 0x4d9   :  { %v2326_v0 = vsel %vm188_vm1, %v2323_v33, %v2325_v43  ;;  %v2357_v18 = vsel %vm359_vm2, %v2354_v58, %v2356_v41  ;;  %v3912_v33 = vld [vmem:[%s5606_s5 + $0x30] sm:$0xff]  }
 0x4da   :  { %v2289_v10 = vpop.permute.xlu0 %2288  ;;  %v2245_v59 = vpop.permute.xlu1 %2244  ;;  %v2342_v31 = vmax.f32 %v2303_v47, %v2326_v0  ;;  %v3918_v0 = vld [vmem:[%s5606_s5 + $0x18] sm:$0xff]  }
 0x4db   :  { %v2305_v11 = vmax.f32 %v2273_v13, %v2289_v10  ;;  %v2267_v22 = vmax.f32 %v5398_v4, %v2245_v59  ;;  %v2372_v4 = vmax.f32 %v2341_v6, %v2355_v56  ;;  %v2377_v13 = vld [vmem:[%s5605_s4 + $0x8] sm:$0xff]  ;;  %v3909_v10 = vld [vmem:[%s5606_s5 + $0x78] sm:$0xff]  }
 0x4dc   :  { %v2373_v40 = vmax.f32 %v2342_v31, %v2357_v18  ;;  %v3910_v59 = vld [vmem:[%s5606_s5 + $0x38] sm:$0xff]   ;;  %3635 = vmatprep.subr.bf16.mxu0 %v3909_v10 }
 0x4dd   :  { %v2327_v15 = vrot.slane %v2305_v11, 1  ;;  %v2358_v3 = vrot.slane %v2305_v11, 2  ;;  %3636 = vmatpush3.bf16.msra.mxu0 %v3910_v59  ;;  %v2841_v59 = vld [vmem:[%s5607_s6] sm:$0xff] }
 0x4de   :  { %v2281_v2 = vpop.permute.xlu0 %2280  ;;  %v2243_v46 = vpop.permute.xlu1 %2242 }
 0x4df   :  { %v2344_v61 = vmax.f32 %v2305_v11, %v2327_v15  ;;  %v2301_v7 = vmax.f32 %v2269_v48, %v2281_v2  ;;  %v2328_v27 = vsel %vm188_vm1, %v2325_v43, %v2327_v15  ;;  %v2359_v17 = vsel %vm359_vm2, %v2356_v41, %v2358_v3  ;;  %v2379_v43 = vld [vmem:[%s5605_s4 + $0x18] sm:$0x3f]  ;;  %v3911_v11 = vld [vmem:[%s5606_s5 + $0x70] sm:$0xff]   ;;  %v3913_v48 = vld [vmem:[%s5606_s5 + $0x68] sm:$0xff]  }
 0x4e0   :  { %v2343_v8 = vmax.f32 %v2304_v50, %v2328_v27  ;;  %v2266_v45 = vmax.f32 %v2204_v34, %v2243_v46  ;;  %3637 = vmatprep.subr.bf16.mxu0 %v3911_v11  ;;  %v3923_v15 = vld [vmem:[%s5606_s5 + $0x88] sm:$0xff]   ;;  %v3916_v2 = vld [vmem:[%s5606_s5 + $0x20] sm:$0xff]   ;;  %v3917_v46 = vld [vmem:[%s5606_s5 + $0x58] sm:$0xff]  }
 0x4e1   :  { %v2375_v62 = vmax.f32 %v2344_v61, %v2358_v3  ;;  %v2319_v57 = vrot.slane %v2301_v7, 1  ;;  %v2350_v21 = vrot.slane %v2301_v7, 2  ;;  %3638 = vmatpush3.bf16.msra.mxu0 %v3912_v33  ;;  %v3914_v3 = vld [vmem:[%s5606_s5 + $0x28] sm:$0xff]   ;;  %v3919_v41 = vld [vmem:[%s5606_s5 + $0x50] sm:$0xff]  }
 0x4e2   :  { %v2279_v26 = vpop.permute.xlu0 %2278  ;;  %v2275_v1 = vpop.permute.xlu1 %2274  ;;  %v2374_v37 = vmax.f32 %v2343_v8, %v2359_v17  ;;  %3639 = vmatprep.subr.bf16.mxu0 %v3913_v48  ;;  %v3920_v61 = vld [vmem:[%s5606_s5 + $0x10] sm:$0xff]   ;;  %v3922_v27 = vld [vmem:[%s5606_s5 + $0x8] sm:$0xff]   ;;  %v3925_v8 = vld [vmem:[%s5606_s5] sm:$0xff]  }
 0x4e3   :  { %v2322_v36 = vsel %vm188_vm1, %v2319_v57, %v2321_v20  ;;  %v2300_v38 = vmax.f32 %v2268_v16, %v2279_v26  ;;  %3735 = vmatprep.subr.msk.mxu1 %vm359_vm2, %v2375_v62  ;;  %v2298_v55 = vmax.f32 %v2266_v45, %v2275_v1  ;;  %v2353_v9 = vsel %vm359_vm2, %v2350_v21, %v2352_v54  ;;  %v3915_v20 = vld [vmem:[%s5606_s5 + $0x60] sm:$0xff]  }
 0x4e4   :  { %3736 = vmatpush3.msk.msra.mxu1 %vm359_vm2, %v2375_v62  ;;  %v2340_v28 = vmax.f32 %v2301_v7, %v2322_v36  ;;  %v3921_v7 = vld [vmem:[%s5606_s5 + $0x48] sm:$0xff]   ;;  %v3924_v16 = vld [vmem:[%s5606_s5 + $0x40] sm:$0xff]  }
 0x4e5   :  { %v2317_v60 = vrot.slane %v2300_v38, 1  ;;  %v2348_v12 = vrot.slane %v2300_v38, 2  ;;  %3737 = vmatprep.subr.mxu1 %v2374_v37  ;;  %v2314_v34 = vrot.slane %v2298_v55, 1  ;;  %v2345_v51 = vrot.slane %v2298_v55, 2  ;;  %3640 = vmatpush3.bf16.msra.mxu0 %v3914_v3  ;;  %v3926_v62 = vld [vmem:[%s5606_s5 + $0x80] sm:$0xff]   ;;  %s3970_s5 = smov 124  }
 0x4e6   :  { %v2277_v19 = vpop.permute.xlu0 %2276  ;;  %3738 = vmatpush3.msra.mxu1 %v2374_v37  ;;  %v2371_v42 = vmax.f32 %v2340_v28, %v2353_v9  ;;  %3641 = vmatprep.subr.bf16.mxu0 %v3915_v20 }
 0x4e7   :  { %v2320_v53 = vsel %vm188_vm1, %v2317_v60, %v2319_v57  ;;  %v2299_v49 = vmax.f32 %v2267_v22, %v2277_v19  ;;  %3739 = vmatprep.subr.mxu1 %v2373_v40  ;;  %v2351_v23 = vsel %vm359_vm2, %v2348_v12, %v2350_v21 }
 0x4e8   :  { %v2339_v29 = vmax.f32 %v2300_v38, %v2320_v53  ;;  %3740 = vmatpush3.msra.mxu1 %v2373_v40 }
 0x4e9   :  { %v2315_v52 = vrot.slane %v2299_v49, 1  ;;  %v2346_v24 = vrot.slane %v2299_v49, 2  ;;  %3741 = vmatprep.subr.mxu1 %v2372_v4  ;;  %3642 = vmatpush3.bf16.msra.mxu0 %v3916_v2 }
 0x4ea   :  { %3742 = vmatpush3.msra.mxu1 %v2372_v4  ;;  %v2370_v30 = vmax.f32 %v2339_v29, %v2351_v23  ;;  %3643 = vmatprep.subr.bf16.mxu0 %v3917_v46 }
 0x4eb   :  { %v2318_v32 = vsel %vm188_vm1, %v2315_v52, %v2317_v60  ;;  %3743 = vmatprep.subr.mxu1 %v2371_v42  ;;  %v2316_v25 = vsel %vm188_vm1, %v2314_v34, %v2315_v52  ;;  %v2349_v50 = vsel %vm359_vm2, %v2346_v24, %v2348_v12  ;;  %v2347_v63 = vsel %vm359_vm2, %v2345_v51, %v2346_v24 }
 0x4ec   :  { %v2338_v5 = vmax.f32 %v2299_v49, %v2318_v32  ;;  %3744 = vmatpush3.msra.mxu1 %v2371_v42  ;;  %v2337_v14 = vmax.f32 %v2298_v55, %v2316_v25 }
 0x4ed   :  { %3745 = vmatprep.subr.mxu1 %v2370_v30  ;;  %3644 = vmatpush3.bf16.msra.mxu0 %v3918_v0 }
 0x4ee   :  { %3746 = vmatpush3.msra.mxu1 %v2370_v30  ;;  %v2369_v44 = vmax.f32 %v2338_v5, %v2349_v50  ;;  %v2368_v47 = vmax.f32 %v2337_v14, %v2347_v63  ;;  %3645 = vmatprep.subr.bf16.mxu0 %v3919_v41 }
 0x4f0   :  { %3747 = vmatprep.subr.mxu1 %v2369_v44 }
 0x4f1   :  { %3748 = vmatpush3.msra.mxu1 %v2369_v44  ;;  %3646 = vmatpush3.bf16.msra.mxu0 %v3920_v61 }
 0x4f2   :  { %3749 = vmatprep.subr.mxu1 %v2368_v47  ;;  %3647 = vmatprep.subr.bf16.mxu0 %v3921_v7 }
 0x4f3   :  { %3750 = vmatpush3.msra.mxu1 %v2368_v47 }
 0x4f4   :  { %3752 = vmatmul.mubr.msk.f32.vlgmr.msra.gmra.mxu1 %vm2380_vm10, %v2377_v13  ;;  %3757 = vmatprep.subr.bf16.mxu1 %v3923_v15 }
 0x4f5   :  { %3754 = vmatprep.mubr.msk.f32.mxu1 %vm2380_vm10, %v2378_v35  ;;  %3758 = vmatpush3.bf16.msra.mxu1 %v3923_v15 }
 0x4f6   :  { %3648 = vmatpush3.bf16.msra.mxu0 %v3922_v27  ;;  %3759 = vmatprep.subr.bf16.mxu1 %v3926_v62 }
 0x4f7   :  { %3649 = vmatprep.subr.bf16.mxu0 %v3924_v16 }
 0x4f8   :  { %3755 = vmatmul.mubr.msk.f32.gmra.mxu1 %vm2380_vm10, %v2379_v43 }
 0x4f9   :  { %3760 = vmatpush3.bf16.msra.mxu1 %v3926_v62 }
 0x4fa   :  { %3650 = vmatpush3.bf16.msra.mxu0 %v3925_v8 }
 0x4fb   :  { %3776 = vmatprep.subr.bf16.mxu0 %v5710_v39 }
 0x5b4   :  { %v3753_v57 = vpop.f32.mrf.mxu1 }
 0x5b6   :  { %v2462_v17 = vpop.f32.mrf.mxu1 }
 0x5b7   :  { %v2481_v31 = vpack.c.bf16 %v3753_v57, %v2462_v17 }
 0x5b8   :  { %v3756_v58 = vpop.f32.mrf.mxu1 }
 0x5b9   :  { %v2486_v45 = vshll.u32 %v2481_v31, 16  ;;  %v2484_v54 = vshrl.u32 %v2481_v31, 16  ;;  %v2504_v36 = vrot.slane %v2481_v31, 1 }
 0x5ba   :  { %v2472_v26 = vpop.f32.mrf.mxu1 }
 0x5bb   :  { %v2488_v1 = vrot.slane %v2486_v45, 1  ;;  %v2482_v37 = vpack.c.bf16 %v3756_v58, %v2472_v26 }
 0x5bd   :  { %v2505_v38 = vrot.slane %v2482_v37, 1  ;;  %v2491_v6 = vshll.u32 %v2482_v37, 16  ;;  %v2489_v21 = vor.u32 %v2488_v1, %v2484_v54  ;;  %v2495_v28 = vshrl.u32 %v2482_v37, 16 }
 0x5bf   :  { %v2506_v22 = vsel %vm188_vm1, %v2504_v36, %v2505_v38  ;;  %v2493_v55 = vrot.slane %v2491_v6, 1 }
 0x5c0   :  { %2507 = vrot.lane.b32.xlu1 %v2506_v22, %s3969_s14 }
 0x5c1   :  { %v2494_v18 = vsel %vm98_vm0, %v2489_v21, %v2493_v55  ;;  %v2497_v60 = vor.u32 %v2495_v28, %v2493_v55 }
 0x5c2   :  { %2498 = vrot.lane.b32.xlu0 %v2494_v18, %s3967_s1 }
 0x5c4   :  { %2509 = vrot.lane.b32.xlu1 %v2505_v38, %s3969_s14 }
 0x5c6   :  { %2500 = vrot.lane.b32.xlu0 %v2497_v60, %s3967_s1 }
 0x632   :  { %v2508_v12 = vpop.permute.xlu1 %2507 }
 0x633   :  { %3761 = vmatprep.mubr.msk.bf16.mxu1 %vm2668_vm11, %v2508_v12 }
 0x634   :  { %v2499_v40 = vpop.permute.xlu0 %2498 }
 0x635   :  { %v2512_v19 = vsel %vm952_vm8, %v2481_v31, %v2499_v40  ;;  %v2519_v56 = vsel %vm2517_vm12, %v2499_v40, %v2508_v12 }
 0x636   :  { %2705 = vmatprep.mubr.bf16.mxu0 %v2519_v56  ;;  %v2510_v53 = vpop.permute.xlu1 %2509 }
 0x637   :  { %2706 = vmatmul.mubr.bf16.vlgmr.msra.gmra.mxu0 %v2512_v19  ;;  %3762 = vmatmul.mubr.msk.bf16.vlgmr.msra.gmra.mxu1 %vm2668_vm11, %v2510_v53 }
 0x638   :  { %v2501_v49 = vpop.permute.xlu0 %2500  ;;  %3773 = vmatprep.mubr.msk.f32.mxu1 %vm2843_vm13, %v2841_v59 }
 0x639   :  { %v2522_v4 = vsel %vm2517_vm12, %v2501_v49, %v2510_v53  ;;  %v2515_v29 = vsel %vm952_vm8, %v2482_v37, %v2501_v49  ;;  %v2842_v53 = vld [vmem:[%s5607_s6 + $0x8] sm:$0xf] }
 0x63a   :  { %2713 = vmatprep.mubr.bf16.mxu0 %v2522_v4  ;;  %v3928_v49 = vld [vmem:[%s5608_s7 + $0x8] sm:$0xff]   ;;  %v3927_v4 = vld [vmem:[%s5608_s7 + $0x18] sm:$0xff]  }
 0x63b   :  { %3777 = vmatpush3.bf16.msra.mxu0 %v3927_v4 }
 0x63c   :  { %3778 = vmatprep.subr.bf16.mxu0 %v5710_v39 }
 0x63f   :  { %2714 = vmatmul.mubr.bf16.gmra.mxu0 %v2515_v29  ;;  %v3930_v29 = vld [vmem:[%s5608_s7] sm:$0xff]  }
 0x640   :  { %3780 = vmatprep.mubr.msk.bf16.mxu0 %vm3965_vm3, %v5710_v39 }
 0x6f7   :  { %v3651_v34 = vpop.f32.mrf.mxu0  ;;  %v3763_v9 = vpop.f32.mrf.mxu1 }
 0x6f9   :  { %v3652_v52 = vpop.f32.mrf.mxu0  ;;  %v2756_v24 = vpop.f32.mrf.mxu1 }
 0x6fa   :  { %v3653_v63 = vadd.f32 %v3652_v52, %v3651_v34  ;;  %v3929_v34 = vld [vmem:[%s5608_s7 + $0x10] sm:$0xff]  }
 0x6fb   :  { %v3654_v42 = vpop.f32.mrf.mxu0  ;;  %v3764_v23 = vpop.f32.mrf.mxu1  ;;  %3779 = vmatpush3.bf16.msra.mxu0 %v3929_v34 }
 0x6fc   :  { %v2757_v43 = vadd.f32 %v3653_v63, %v2756_v24  ;;  %3792 = vmatprep.subr.bf16.mxu0 %v5710_v39  ;;  %v3932_v24 = vld [vmem:[%s5608_s7 + $0x38] sm:$0xff]   ;;  %v3937_v63 = vld [vmem:[%s5608_s7 + $0x40] sm:$0xff]  }
 0x6fd   :  { %v3655_v30 = vpop.f32.mrf.mxu0  ;;  %v2759_v5 = vpop.f32.mrf.mxu1 }
 0x6fe   :  { %v3656_v32 = vadd.f32 %v3655_v30, %v3654_v42 }
 0x6ff   :  { %v3657_v25 = vpop.f32.mrf.mxu0 }
 0x700   :  { %v2760_v14 = vadd.f32 %v3656_v32, %v2759_v5  ;;  %v3934_v32 = vld [vmem:[%s5608_s7 + $0x30] sm:$0xff]   ;;  %v3936_v5 = vld [vmem:[%s5608_s7 + $0x58] sm:$0xff]  }
 0x701   :  { %v3658_v51 = vpop.f32.mrf.mxu0 }
 0x702   :  { %v3659_v50 = vadd.f32 %v3658_v51, %v3657_v25  ;;  %2777 = vrot.lane.b32.xlu1 %v2760_v14, %s3970_s5  ;;  %v3933_v25 = vld [vmem:[%s5608_s7 + $0x20] sm:$0xff]   ;;  %v3935_v51 = vld [vmem:[%s5608_s7 + $0x48] sm:$0xff]  }
 0x703   :  { %v3660_v44 = vpop.f32.mrf.mxu0 }
 0x704   :  { %v2765_v47 = vadd.f32 %v3763_v9, %v3659_v50 }
 0x705   :  { %v3661_v13 = vpop.f32.mrf.mxu0 }
 0x706   :  { %v3662_v35 = vadd.f32 %v3661_v13, %v3660_v44  ;;  %2795 = vrot.lane.b32.xlu0 %v2765_v47, %s3968_s3  ;;  %2779 = vrot.lane.b32.xlu1 %v2765_v47, %s3970_s5  ;;  %v3938_v44 = vld [vmem:[%s5608_s7 + $0x50] sm:$0xff]  }
 0x708   :  { %v2768_v10 = vadd.f32 %v3764_v23, %v3662_v35  ;;  %v3931_v23 = vld [vmem:[%s5608_s7 + $0x28] sm:$0xff]  }
 0x70a   :  { %2781 = vrot.lane.b32.xlu0 %v2768_v10, %s3970_s5  ;;  %2775 = vrot.lane.b32.xlu1 %v2757_v43, %s3970_s5 }
 0x70e   :  { %2797 = vrot.lane.b32.xlu0 %v2768_v10, %s3968_s3  ;;  %2791 = vrot.lane.b32.xlu1 %v2757_v43, %s3968_s3 }
 0x712   :  { %2793 = vrot.lane.b32.xlu0 %v2760_v14, %s3968_s3  ;;  %s3315_s3 = sshll.u32 %s3971_s21, 4  ;;  %s3316_s3 = int_to_ptr.vmem [resolvable:$true] %s3315_s3 }
 0x713   :  { %s3939_s28 = scalar_lea.vmem %s3316_s3, 32  ;;  %p3944_p1 = scmp.lt.s32.totalorder %s3316_s3, %s3316_s3 }
 0x714   :  { %p3940_p0 = scmp.ne.s32.totalorder %s3316_s3, %s3939_s28  ;;  %p3945_p2 = scmp.lt.s32.totalorder %s3939_s28, %s3939_s28 }
 0x716   :  { %p3946_p3 = por %p3945_p2, %p3944_p1 }
 0x718   :  { %p3947_p4 = pnand %p3946_p3, %p3940_p0 }
 0x774   :  { %v2778_v11 = vpop.permute.xlu1 %2777 }
 0x775   :  { %v2788_v16 = vmax.f32 %v2760_v14, %v2778_v11 }
 0x778   :  { %v2796_v33 = vpop.permute.xlu0 %2795  ;;  %v2780_v48 = vpop.permute.xlu1 %2779 }
 0x779   :  { %v2789_v15 = vmax.f32 %v2765_v47, %v2780_v48 }
 0x77b   :  { %v2805_v2 = vmax.f32 %v2789_v15, %v2796_v33 }
 0x77c   :  { %v2782_v3 = vpop.permute.xlu0 %2781  ;;  %v2776_v20 = vpop.permute.xlu1 %2775 }
 0x77d   :  { %v2790_v46 = vmax.f32 %v2768_v10, %v2782_v3  ;;  %v2787_v0 = vmax.f32 %v2757_v43, %v2776_v20  ;;  %v2814_v8 = vrot.slane %v2805_v2, 1  ;;  %v2829_v31 = vrot.slane %v2805_v2, 2 }
 0x780   :  { %v2798_v41 = vpop.permute.xlu0 %2797  ;;  %v2792_v61 = vpop.permute.xlu1 %2791 }
 0x781   :  { %v2806_v7 = vmax.f32 %v2790_v46, %v2798_v41  ;;  %v2803_v27 = vmax.f32 %v2787_v0, %v2792_v61 }
 0x783   :  { %v2816_v62 = vrot.slane %v2806_v7, 1  ;;  %v2831_v57 = vrot.slane %v2806_v7, 2  ;;  %v2811_v1 = vrot.slane %v2803_v27, 1  ;;  %v2826_v60 = vrot.slane %v2803_v27, 2 }
 0x784   :  { %v2794_v17 = vpop.permute.xlu0 %2793 }
 0x785   :  { %v2825_v58 = vmax.f32 %v2806_v7, %v2816_v62  ;;  %v2804_v45 = vmax.f32 %v2788_v16, %v2794_v17  ;;  %v2817_v26 = vsel %vm188_vm1, %v2814_v8, %v2816_v62  ;;  %v2832_v6 = vsel %vm359_vm2, %v2829_v31, %v2831_v57 }
 0x786   :  { %v2824_v37 = vmax.f32 %v2805_v2, %v2817_v26 }
 0x787   :  { %v2840_v54 = vmax.f32 %v2825_v58, %v2831_v57  ;;  %v2812_v36 = vrot.slane %v2804_v45, 1  ;;  %v2827_v38 = vrot.slane %v2804_v45, 2 }
 0x788   :  { %v2839_v22 = vmax.f32 %v2824_v37, %v2832_v6 }
 0x789   :  { %v2815_v21 = vsel %vm188_vm1, %v2812_v36, %v2814_v8  ;;  %3765 = vmatprep.subr.msk.mxu1 %vm2850_vm14, %v2840_v54  ;;  %v2813_v55 = vsel %vm188_vm1, %v2811_v1, %v2812_v36  ;;  %v2830_v12 = vsel %vm359_vm2, %v2827_v38, %v2829_v31  ;;  %v2828_v19 = vsel %vm359_vm2, %v2826_v60, %v2827_v38  ;;  %v3489_v31 = vld [vmem:[%s5609_s8] ss:$0 sm:$0xff] }
 0x78a   :  { %v2823_v18 = vmax.f32 %v2804_v45, %v2815_v21  ;;  %3766 = vmatpush3.msk.msra.mxu1 %vm2850_vm14, %v2840_v54  ;;  %v2822_v28 = vmax.f32 %v2803_v27, %v2813_v55 }
 0x78b   :  { %3767 = vmatprep.subr.mxu1 %v2839_v22 }
 0x78c   :  { %3768 = vmatpush3.msra.mxu1 %v2839_v22  ;;  %v2838_v40 = vmax.f32 %v2823_v18, %v2830_v12  ;;  %v2837_v56 = vmax.f32 %v2822_v28, %v2828_v19 }
 0x78e   :  { %3769 = vmatprep.subr.mxu1 %v2838_v40 }
 0x78f   :  { %3770 = vmatpush3.msra.mxu1 %v2838_v40 }
 0x790   :  { %3771 = vmatprep.subr.mxu1 %v2837_v56 }
 0x791   :  { %3772 = vmatpush3.msra.mxu1 %v2837_v56 }
 0x792   :  { %3774 = vmatmul.mubr.msk.f32.vlgmr.msra.gmra.mxu1 %vm2843_vm13, %v2842_v53  ;;  %3784 = vmatprep.subr.bf16.mxu1 %v5710_v39 }
 0x793   :  { %3788 = vmatprep.mubr.msk.bf16.mxu1 %vm3965_vm3, %v5710_v39  ;;  %3785 = vmatpush3.bf16.msra.mxu1 %v3928_v49 }
 0x794   :  { %3786 = vmatprep.subr.bf16.mxu1 %v5710_v39 }
 0x797   :  { %3787 = vmatpush3.bf16.msra.mxu1 %v3930_v29 }
 0x798   :  { %3800 = vmatprep.subr.bf16.mxu1 %v5710_v39 }
 0x852   :  { %v3775_v9 = vpop.f32.mrf.mxu1 }
 0x854   :  { %v2920_v52 = vpop.f32.mrf.mxu1 }
 0x855   :  { %v2929_v42 = vpack.c.bf16 %v3775_v9, %v2920_v52 }
 0x857   :  { %v2940_v30 = vrot.slane %v2929_v42, 1  ;;  %3789 = vmatmul.mubr.msk.bf16.vlgmr.msra.gmra.mxu1 %vm2668_vm11, %v2929_v42  ;;  %v3118_v14 = vrot.slane %v2929_v42, 3  ;;  %v3056_v50 = vrot.slane %v2929_v42, 2  ;;  %v3242_v47 = vrot.slane %v2929_v42, 5 }
 0x858   :  { %3801 = vmatpush3.bf16.msra.mxu1 %v3932_v24  ;;  %3804 = vmatprep.mubr.msk.bf16.mxu1 %vm3965_vm3, %v5710_v39  ;;  %v3180_v13 = vrot.slane %v2929_v42, 4 }
 0x859   :  { %3781 = vmatmul.mubr.msk.bf16.vlgmr.msra.gmra.mxu0 %vm2668_vm11, %v2940_v30  ;;  %3802 = vmatprep.subr.bf16.mxu1 %v5710_v39 }
 0x85a   :  { %3793 = vmatpush3.bf16.msra.mxu0 %v3931_v23  ;;  %3796 = vmatprep.mubr.msk.bf16.mxu0 %vm3965_vm3, %v5710_v39 }
 0x85b   :  { %3794 = vmatprep.subr.bf16.mxu0 %v5710_v39 }
 0x85c   :  { %3803 = vmatpush3.bf16.msra.mxu1 %v3934_v32 }
 0x85d   :  { %3816 = vmatprep.subr.bf16.mxu1 %v5710_v39 }
 0x85e   :  { %3795 = vmatpush3.bf16.msra.mxu0 %v3933_v25 }
 0x85f   :  { %3805 = vmatmul.mubr.msk.bf16.vlgmr.msra.gmra.mxu1 %vm2668_vm11, %v3118_v14  ;;  %3808 = vmatprep.subr.bf16.mxu0 %v5710_v39 }
 0x860   :  { %3817 = vmatpush3.bf16.msra.mxu1 %v3936_v5  ;;  %3820 = vmatprep.mubr.msk.bf16.mxu1 %vm3965_vm3, %v5710_v39 }
 0x861   :  { %3797 = vmatmul.mubr.msk.bf16.vlgmr.msra.gmra.mxu0 %vm2668_vm11, %v3056_v50  ;;  %3818 = vmatprep.subr.bf16.mxu1 %v5710_v39 }
 0x862   :  { %3809 = vmatpush3.bf16.msra.mxu0 %v3935_v51  ;;  %3812 = vmatprep.mubr.msk.bf16.mxu0 %vm3965_vm3, %v5710_v39 }
 0x863   :  { %3810 = vmatprep.subr.bf16.mxu0 %v5710_v39 }
 0x864   :  { %3819 = vmatpush3.bf16.msra.mxu1 %v3938_v44 }
 0x866   :  { %3811 = vmatpush3.bf16.msra.mxu0 %v3937_v63 }
 0x867   :  { %3821 = vmatmul.mubr.msk.bf16.vlgmr.msra.gmra.mxu1 %vm2668_vm11, %v3242_v47 }
 0x869   :  { %3813 = vmatmul.mubr.msk.bf16.vlgmr.msra.gmra.mxu0 %vm2668_vm11, %v3180_v13 }
 0x917   :  { %v3045_v35 = vpop.f32.mrf.mxu1 }
 0x919   :  { %v2990_v43 = vpop.f32.mrf.mxu0  ;;  %v3790_v10 = vpop.f32.mrf.mxu1 }
 0x91a   :  { %v3046_v39 = vadd.f32 %v3045_v35, %v2990_v43 }
 0x91b   :  { %v3782_v59 = vpop.f32.mrf.mxu0  ;;  %v3048_v11 = vpop.f32.mrf.mxu1 }
 0x91d   :  { %v2993_v33 = vpop.f32.mrf.mxu0  ;;  %v3791_v48 = vpop.f32.mrf.mxu1 }
 0x91f   :  { %v3783_v15 = vpop.f32.mrf.mxu0  ;;  %v3168_v3 = vpop.f32.mrf.mxu1 }
 0x921   :  { %v3106_v20 = vpop.f32.mrf.mxu0  ;;  %v3806_v2 = vpop.f32.mrf.mxu1 }
 0x922   :  { %v3112_v41 = vadd.f32 %v3106_v20, %v3046_v39 }
 0x923   :  { %v3798_v46 = vpop.f32.mrf.mxu0  ;;  %v3171_v0 = vpop.f32.mrf.mxu1 }
 0x924   :  { %v3174_v8 = vadd.f32 %v3168_v3, %v3112_v41 }
 0x925   :  { %v3109_v61 = vpop.f32.mrf.mxu0  ;;  %v3807_v7 = vpop.f32.mrf.mxu1 }
 0x927   :  { %v3799_v27 = vpop.f32.mrf.mxu0  ;;  %v3292_v16 = vpop.f32.mrf.mxu1 }
 0x929   :  { %v3230_v62 = vpop.f32.mrf.mxu0  ;;  %v3822_v57 = vpop.f32.mrf.mxu1 }
 0x92a   :  { %v3236_v17 = vadd.f32 %v3230_v62, %v3174_v8 }
 0x92b   :  { %v3814_v58 = vpop.f32.mrf.mxu0  ;;  %v3295_v45 = vpop.f32.mrf.mxu1 }
 0x92c   :  { %v3298_v26 = vadd.f32 %v3292_v16, %v3236_v17 }
 0x92d   :  { %v3233_v1 = vpop.f32.mrf.mxu0  ;;  %v3823_v37 = vpop.f32.mrf.mxu1 }
 0x92e   :  { %v3306_v54 = vadd.f32 %v3489_v31, %v3298_v26 }
 0x92f   :  { %v3815_v36 = vpop.f32.mrf.mxu0 }
 0x930   :  { %3308 = vst.msk [vmem:[#allocation2] sm:$0x3] %vm3307_vm15, %v3306_v54 }
 0x931   :  { %3950 = shalt.err (!%p3947_p4)
}
 0x932   :  { %3318 = dma.vmem_to_hbm [thread:$0]  %s3316_s3, 32, %s5610_s9, [#allocation3]  }
 0x933   :  { %3959 = dma.done.wait [#allocation3], 32  }
 0x934   :  { %3960 = vsyncadd [#allocation3], 4294967264 }
 0x935   :  { %3322 = vsyncpa [#allocation3], 1 }

</bundles_post_ra>
